<compile_context>
chip_gen: v7x
topology: tpu7x:2x2x1
jax: 0.10.0
libtpu: 0.0.40
codegen_flags: <defaults>
</compile_context>

<pallas_src>
import functools

import jax
import jax.numpy as jnp
from jax.experimental import pallas as pl
from jax.experimental.pallas import tpu as pltpu

LANE = 128
SUBLANE = 8


def _round_up(x, m):
    return (x + m - 1) // m * m


# ----------------- kernel 1: conv1d(k=s) + LeakyReLU + hoisted LSTM input projection -----
def conv_gates_kernel(patch_ref, wc_ref, bc_ref, wih_ref, bg_ref, o_ref, *, slope):
    # patch_ref: (RB, K*C)   rows are time-major (row = t * Bp + b)
    # wc_ref:    (K*C, Fp)   conv weight, F padded to a lane multiple
    # bc_ref:    (1, Fp)     conv bias
    # wih_ref:   (Fp, 4*Hp)  LSTM input projection (each gate padded to Hp lanes)
    # bg_ref:    (1, 4*Hp)   b_ih + b_hh (gate-padded)
    # o_ref:     (RB, 4*Hp)  precomputed input-side gate pre-activations (f32)
    act = jnp.dot(patch_ref[...], wc_ref[...], preferred_element_type=jnp.float32)
    act = act + bc_ref[...]
    act = jnp.maximum(act, slope * act)                       # LeakyReLU(slope)
    o_ref[...] = (
        jnp.dot(act.astype(wih_ref.dtype), wih_ref[...],
                preferred_element_type=jnp.float32)
        + bg_ref[...])


# ----------------- kernel 2: LSTM recurrence (h @ W_hh only) + fused final Linear --------
def lstm_fc_kernel(gx_ref, whh_ref, wfc_ref, bfc_ref, out_ref, h_scr, c_scr,
                   *, seq_len, time_blk, hp, needs_mask):
    # gx_ref:  (TT, BB, 4*Hp)  precomputed x_t @ W_ih + b for this time chunk / batch block
    # whh_ref: (Hp, 4*Hp)      recurrent weight (gate-padded)
    # wfc_ref: (Hp, Op)        final Linear weight ; bfc_ref: (1, Op)
    # out_ref: (BB, Op)        fc(h_T)
    # h_scr/c_scr: (BB, Hp)    hidden/cell state resident in VMEM across time chunks
    s = pl.program_id(1)                      # time-chunk index ("arbitrary" / serial)

    @pl.when(s == 0)
    def _init():
        h_scr[...] = jnp.zeros_like(h_scr)
        c_scr[...] = jnp.zeros_like(c_scr)

    def step(tt, carry):
        h, c = carry
        gates = gx_ref[tt] + jnp.dot(h.astype(whh_ref.dtype), whh_ref[...],
                                     preferred_element_type=jnp.float32)
        # lane-aligned 128-wide gate slices (no cross-lane shuffles)
        i = jax.nn.sigmoid(gates[:, 0 * hp:1 * hp])
        f = jax.nn.sigmoid(gates[:, 1 * hp:2 * hp])
        g = jnp.tanh(gates[:, 2 * hp:3 * hp])
        o = jax.nn.sigmoid(gates[:, 3 * hp:4 * hp])
        c_new = f * c + i * g
        h_new = o * jnp.tanh(c_new)
        if needs_mask:                        # only emitted if T was padded up to Tp
            valid = (s * time_blk + tt) < seq_len
            h_new = jnp.where(valid, h_new, h)
            c_new = jnp.where(valid, c_new, c)
        return h_new, c_new

    h, c = jax.lax.fori_loop(0, time_blk, step, (h_scr[...], c_scr[...]), unroll=True)
    h_scr[...] = h
    c_scr[...] = c

    @pl.when(s == pl.num_programs(1) - 1)
    def _final():
        # TODO(synk): nn.Dropout is identity in eval mode; training-mode dropout not implemented.
        out_ref[...] = (
            jnp.dot(h.astype(wfc_ref.dtype), wfc_ref[...],
                    preferred_element_type=jnp.float32)
            + bfc_ref[...])


# ----------------------------- full CRNN forward -----------------------------------------
def crnn_forward(x, params, *, negative_slope=0.1, compute_dtype=jnp.float32):
    """x: (B, S, C) — same tensor the PyTorch module receives (before its transpose(1,2))."""
    B, S, C = x.shape
    w_conv = params["w_conv"]                  # torch Conv1d layout (F, C, K)
    F, _, K = w_conv.shape
    stride = K                                 # module: kernel_size=5, stride=5
    T = (S - K) // stride + 1
    H = params["w_hh"].shape[1]                # torch w_hh: (4H, H)
    O = params["w_fc"].shape[0]                # torch fc weight: (O, H)

    # ---- lane/sublane-padded sizes ------------------------------------------------------
    Bp = _round_up(B, SUBLANE)
    if Bp > 128:                               # split big batches across a parallel grid axis
        BB = 128
        Bp = _round_up(Bp, BB)
    else:
        BB = Bp
    Fp = _round_up(F, LANE)
    Hp = _round_up(H, LANE)
    Op = _round_up(O, LANE)

    # time chunk: keep ~2 MiB of gate activations per (double-buffered) block, unroll <= 32
    TT = max(1, min(T, 32, (2 * 1024 * 1024) // (BB * 4 * Hp * 4)))
    Tp = _round_up(T, TT)
    needs_mask = (Tp != T)

    f32 = jnp.float32

    # ---- weight preparation: gate-padded, lane-dense layouts ----------------------------
    # conv weight: w2[k*C + c, f] = w_conv[f, c, k]
    w2 = jnp.transpose(w_conv, (2, 1, 0)).reshape(K * C, F)
    wc = jnp.zeros((K * C, Fp), f32).at[:, :F].set(w2).astype(compute_dtype)
    bc = jnp.zeros((1, Fp), f32).at[0, :F].set(params["b_conv"])

    # LSTM input projection (hoisted out of the recurrence); each gate padded to Hp lanes.
    wih = jnp.zeros((4, Hp, Fp), f32).at[:, :H, :F].set(params["w_ih"].reshape(4, H, F))
    wih = wih.transpose(2, 0, 1).reshape(Fp, 4 * Hp).astype(compute_dtype)
    bg = jnp.zeros((4, Hp), f32).at[:, :H].set(
        (params["b_ih"] + params["b_hh"]).reshape(4, H)).reshape(1, 4 * Hp)

    whh = jnp.zeros((4, Hp, Hp), f32).at[:, :H, :H].set(params["w_hh"].reshape(4, H, H))
    whh = whh.transpose(2, 0, 1).reshape(Hp, 4 * Hp).astype(compute_dtype)

    wfc = jnp.zeros((Hp, Op), f32).at[:H, :O].set(params["w_fc"].T).astype(compute_dtype)
    bfc = jnp.zeros((1, Op), f32).at[0, :O].set(params["b_fc"])

    # ---- time-major, batch-padded, non-overlapping conv patches -------------------------
    # (transpose the small input once outside; activations are produced time-major directly)
    xp = jnp.zeros((Bp, Tp * K, C), f32).at[:B, :T * K, :].set(x[:, :T * K, :])
    patches = (xp.reshape(Bp, Tp, K * C)
                 .transpose(1, 0, 2)                 # (Tp, Bp, K*C) time-major
                 .reshape(Tp * Bp, K * C)
                 .astype(compute_dtype))

    # ---- kernel 1: conv + LeakyReLU + x @ W_ih + b, tiled over time-chunks of rows -------
    RB = TT * Bp                                     # rows per grid step (time-chunk * batch)
    gx = pl.pallas_call(
        functools.partial(conv_gates_kernel, slope=negative_slope),
        out_shape=jax.ShapeDtypeStruct((Tp * Bp, 4 * Hp), f32),
        grid_spec=pltpu.PrefetchScalarGridSpec(
            num_scalar_prefetch=0,
            grid=(Tp // TT,),
            in_specs=[
                pl.BlockSpec((RB, K * C), lambda r: (r, 0)),
                pl.BlockSpec((K * C, Fp), lambda r: (0, 0)),
                pl.BlockSpec((1, Fp), lambda r: (0, 0)),
                pl.BlockSpec((Fp, 4 * Hp), lambda r: (0, 0)),
                pl.BlockSpec((1, 4 * Hp), lambda r: (0, 0)),
            ],
            out_specs=pl.BlockSpec((RB, 4 * Hp), lambda r: (r, 0)),
        ),
        compiler_params=pltpu.CompilerParams(
            dimension_semantics=("parallel",),
            vmem_limit_bytes=32 * 1024 * 1024),
    )(patches, wc, bc, wih, bg)
    gx = gx.reshape(Tp, Bp, 4 * Hp)                  # contiguous reshape: no data movement

    # ---- kernel 2: serial LSTM recurrence over time chunks + fused final Linear ---------
    out = pl.pallas_call(
        functools.partial(lstm_fc_kernel, seq_len=T, time_blk=TT, hp=Hp,
                          needs_mask=needs_mask),
        out_shape=jax.ShapeDtypeStruct((Bp, Op), f32),
        grid_spec=pltpu.PrefetchScalarGridSpec(
            num_scalar_prefetch=0,
            grid=(Bp // BB, Tp // TT),               # (batch blocks: parallel, time: serial)
            in_specs=[
                pl.BlockSpec((TT, BB, 4 * Hp), lambda b, s: (s, b, 0)),
                pl.BlockSpec((Hp, 4 * Hp), lambda b, s: (0, 0)),
                pl.BlockSpec((Hp, Op), lambda b, s: (0, 0)),
                pl.BlockSpec((1, Op), lambda b, s: (0, 0)),
            ],
            out_specs=pl.BlockSpec((BB, Op), lambda b, s: (b, 0)),
            scratch_shapes=[
                pltpu.VMEM((BB, Hp), jnp.float32),   # h
                pltpu.VMEM((BB, Hp), jnp.float32),   # c
            ],
        ),
        compiler_params=pltpu.CompilerParams(
            dimension_semantics=("parallel", "arbitrary"),
            vmem_limit_bytes=32 * 1024 * 1024),
    )(gx, whh, wfc, bfc)

    return out[:B, :O]


# ----------------------------- params & pure-JAX reference -------------------------------
def init_params(key, input_size, feature_size, hidden_size, output_size, kernel_size=5):
    ks = jax.random.split(key, 7)
    s = 0.1
    return {
        # torch layouts
        "w_conv": s * jax.random.normal(ks[0], (feature_size, input_size, kernel_size), jnp.float32),
        "b_conv": s * jax.random.normal(ks[1], (feature_size,), jnp.float32),
        "w_ih":   s * jax.random.normal(ks[2], (4 * hidden_size, feature_size), jnp.float32),
        "w_hh":   s * jax.random.normal(ks[3], (4 * hidden_size, hidden_size), jnp.float32),
        "b_ih":   s * jax.random.normal(ks[4], (4 * hidden_size,), jnp.float32),
        "b_hh":   s * jax.random.normal(ks[5], (4 * hidden_size,), jnp.float32),
        "w_fc":   s * jax.random.normal(ks[6], (output_size, hidden_size), jnp.float32),
        "b_fc":   jnp.zeros((output_size,), jnp.float32),
    }


def crnn_reference(x, params, negative_slope=0.1):
    """Pure-JAX mirror of the PyTorch CRNN forward (eval mode)."""
    B, S, C = x.shape
    F, _, K = params["w_conv"].shape
    T = (S - K) // K + 1
    H = params["w_hh"].shape[1]
    prec = jax.lax.Precision.HIGHEST
    xw = x[:, :T * K, :].reshape(B, T, K, C)
    p = jnp.einsum("btkc,fck->btf", xw, params["w_conv"], precision=prec) + params["b_conv"]
    p = jnp.where(p > 0, p, negative_slope * p)
    b = params["b_ih"] + params["b_hh"]
    h = jnp.zeros((B, H), jnp.float32)
    c = jnp.zeros((B, H), jnp.float32)
    for t in range(T):
        gates = (jnp.dot(p[:, t, :], params["w_ih"].T, precision=prec)
                 + jnp.dot(h, params["w_hh"].T, precision=prec) + b)
        i = jax.nn.sigmoid(gates[:, 0 * H:1 * H])
        f = jax.nn.sigmoid(gates[:, 1 * H:2 * H])
        g = jnp.tanh(gates[:, 2 * H:3 * H])
        o = jax.nn.sigmoid(gates[:, 3 * H:4 * H])
        c = f * c + i * g
        h = o * jnp.tanh(c)
    return jnp.dot(h, params["w_fc"].T, precision=prec) + params["b_fc"]


if __name__ == "__main__":
    # small shapes: batch=2, seq=40 (-> 8 conv/LSTM steps), input_size=4,
    # feature_size=8, hidden_size=32, output_size=4
    B, S, C = 2, 40, 4
    FEAT, HID, OUT = 8, 32, 4

    key = jax.random.PRNGKey(0)
    kx, kp = jax.random.split(key)
    x = jax.random.normal(kx, (B, S, C), jnp.float32)
    params = init_params(kp, C, FEAT, HID, OUT)

    y = jax.jit(crnn_forward)(x, params)
    jax.block_until_ready(y)
    assert y.shape == (B, OUT)

    y_ref = crnn_reference(x, params)
    max_diff = float(jnp.max(jnp.abs(y - y_ref)))
    assert jnp.allclose(y, y_ref, atol=1e-2, rtol=1e-2), f"mismatch vs reference: {max_diff}"
    print("KERNEL_OK")
</pallas_src>

<mosaic_0001>
module attributes {stable_mosaic.version = 11 : i64} {
  func.func @conv_gates_kernel(%arg0: i32, %arg1: memref<64x20xf32, #tpu.memory_space<vmem>>, %arg2: memref<20x128xf32, #tpu.memory_space<vmem>>, %arg3: memref<1x128xf32, #tpu.memory_space<vmem>>, %arg4: memref<128x512xf32, #tpu.memory_space<vmem>>, %arg5: memref<1x512xf32, #tpu.memory_space<vmem>>, %arg6: memref<64x512xf32, #tpu.memory_space<vmem>>) attributes {dimension_semantics = [#tpu.dimension_semantics<parallel>], iteration_bounds = array<i64: 1>, scalar_prefetch = 0 : i64, scratch_operands = 0 : i64, tpu.core_type = #tpu.core_type<tc>, window_params = [{transform_indices = @transform_0, window_bounds = array<i64: 64, 20>}, {pipeline_mode = #tpu.pipeline_mode<synchronous>, transform_indices = @transform_1, window_bounds = array<i64: 20, 128>}, {pipeline_mode = #tpu.pipeline_mode<synchronous>, transform_indices = @transform_2, window_bounds = array<i64: 1, 128>}, {pipeline_mode = #tpu.pipeline_mode<synchronous>, transform_indices = @transform_3, window_bounds = array<i64: 128, 512>}, {pipeline_mode = #tpu.pipeline_mode<synchronous>, transform_indices = @transform_4, window_bounds = array<i64: 1, 512>}, {transform_indices = @transform_5, window_bounds = array<i64: 64, 512>}]} {
    %c0 = arith.constant 0 : index
    %c0_0 = arith.constant 0 : index
    %0 = vector.load %arg1[%c0, %c0_0] : memref<64x20xf32, #tpu.memory_space<vmem>>, vector<64x20xf32>
    %c0_1 = arith.constant 0 : index
    %c0_2 = arith.constant 0 : index
    %1 = vector.load %arg2[%c0_1, %c0_2] : memref<20x128xf32, #tpu.memory_space<vmem>>, vector<20x128xf32>
    %cst = arith.constant dense<0.000000e+00> : vector<64x128xf32>
    %2 = tpu.matmul %0, %1, %cst {dimension_numbers = #tpu.dot_dimension_numbers<[1], [0], [0], [1], [0, 0, 1, 1], [], []>} : vector<64x20xf32>, vector<20x128xf32>, vector<64x128xf32> -> vector<64x128xf32>
    %c0_3 = arith.constant 0 : index
    %c0_4 = arith.constant 0 : index
    %3 = vector.load %arg3[%c0_3, %c0_4] : memref<1x128xf32, #tpu.memory_space<vmem>>, vector<1x128xf32>
    %4 = vector.broadcast %3 : vector<1x128xf32> to vector<64x128xf32>
    %5 = arith.addf %2, %4 : vector<64x128xf32>
    %cst_5 = arith.constant 1.000000e-01 : f32
    %6 = vector.broadcast %cst_5 : f32 to vector<64x128xf32>
    %7 = arith.mulf %6, %5 : vector<64x128xf32>
    %8 = arith.maximumf %5, %7 : vector<64x128xf32>
    %c0_6 = arith.constant 0 : index
    %c0_7 = arith.constant 0 : index
    %9 = vector.load %arg4[%c0_6, %c0_7] : memref<128x512xf32, #tpu.memory_space<vmem>>, vector<128x512xf32>
    %cst_8 = arith.constant dense<0.000000e+00> : vector<64x512xf32>
    %10 = tpu.matmul %8, %9, %cst_8 {dimension_numbers = #tpu.dot_dimension_numbers<[1], [0], [0], [1], [0, 0, 1, 1], [], []>} : vector<64x128xf32>, vector<128x512xf32>, vector<64x512xf32> -> vector<64x512xf32>
    %c0_9 = arith.constant 0 : index
    %c0_10 = arith.constant 0 : index
    %11 = vector.load %arg5[%c0_9, %c0_10] : memref<1x512xf32, #tpu.memory_space<vmem>>, vector<1x512xf32>
    %12 = vector.broadcast %11 : vector<1x512xf32> to vector<64x512xf32>
    %13 = arith.addf %10, %12 : vector<64x512xf32>
    %c0_11 = arith.constant 0 : index
    %c0_12 = arith.constant 0 : index
    %14 = vector.load %arg6[%c0_11, %c0_12] : memref<64x512xf32, #tpu.memory_space<vmem>>, vector<64x512xf32>
    tpu.vector_store %arg6[%c0_11, %c0_12], %13 {strides = array<i32>} : memref<64x512xf32, #tpu.memory_space<vmem>>, vector<64x512xf32>,
    return
  }
  func.func @transform_0(%arg0: i32) -> (i32, i32) {
    %c0_i32 = arith.constant 0 : i32
    %c0_i32_0 = arith.constant 0 : i32
    return %arg0, %c0_i32 : i32, i32
  }
  func.func @transform_1(%arg0: i32) -> (i32, i32) {
    %c0_i32 = arith.constant 0 : i32
    %c0_i32_0 = arith.constant 0 : i32
    %c0_i32_1 = arith.constant 0 : i32
    return %c0_i32, %c0_i32_0 : i32, i32
  }
  func.func @transform_2(%arg0: i32) -> (i32, i32) {
    %c0_i32 = arith.constant 0 : i32
    %c0_i32_0 = arith.constant 0 : i32
    %c0_i32_1 = arith.constant 0 : i32
    return %c0_i32, %c0_i32_0 : i32, i32
  }
  func.func @transform_3(%arg0: i32) -> (i32, i32) {
    %c0_i32 = arith.constant 0 : i32
    %c0_i32_0 = arith.constant 0 : i32
    %c0_i32_1 = arith.constant 0 : i32
    return %c0_i32, %c0_i32_0 : i32, i32
  }
  func.func @transform_4(%arg0: i32) -> (i32, i32) {
    %c0_i32 = arith.constant 0 : i32
    %c0_i32_0 = arith.constant 0 : i32
    %c0_i32_1 = arith.constant 0 : i32
    return %c0_i32, %c0_i32_0 : i32, i32
  }
  func.func @transform_5(%arg0: i32) -> (i32, i32) {
    %c0_i32 = arith.constant 0 : i32
    %c0_i32_0 = arith.constant 0 : i32
    return %arg0, %c0_i32 : i32, i32
  }
}

module attributes {stable_mosaic.version = 11 : i64} {
  func.func @lstm_fc_kernel(%arg0: i32, %arg1: i32, %arg2: memref<8x8x512xf32, #tpu.memory_space<vmem>>, %arg3: memref<128x512xf32, #tpu.memory_space<vmem>>, %arg4: memref<128x128xf32, #tpu.memory_space<vmem>>, %arg5: memref<1x128xf32, #tpu.memory_space<vmem>>, %arg6: memref<8x128xf32, #tpu.memory_space<vmem>>, %arg7: memref<8x128xf32, #tpu.memory_space<vmem>>, %arg8: memref<8x128xf32, #tpu.memory_space<vmem>>) attributes {dimension_semantics = [#tpu.dimension_semantics<parallel>, #tpu.dimension_semantics<arbitrary>], iteration_bounds = array<i64: 1, 1>, scalar_prefetch = 0 : i64, scratch_operands = 2 : i64, tpu.core_type = #tpu.core_type<tc>, window_params = [{transform_indices = @transform_0, window_bounds = array<i64: 8, 8, 512>}, {pipeline_mode = #tpu.pipeline_mode<synchronous>, transform_indices = @transform_1, window_bounds = array<i64: 128, 512>}, {pipeline_mode = #tpu.pipeline_mode<synchronous>, transform_indices = @transform_2, window_bounds = array<i64: 128, 128>}, {pipeline_mode = #tpu.pipeline_mode<synchronous>, transform_indices = @transform_3, window_bounds = array<i64: 1, 128>}, {transform_indices = @transform_4, window_bounds = array<i64: 8, 128>}]} {
    %c0_i32 = arith.constant 0 : i32
    %0 = arith.cmpi eq, %arg1, %c0_i32 : i32
    %1 = arith.extui %0 : i1 to i32
    %c0_i32_0 = arith.constant 0 : i32
    %2 = arith.cmpi ne, %1, %c0_i32_0 : i32
    scf.if %2 {
      %cst_74 = arith.constant 0.000000e+00 : f32
      %258 = vector.broadcast %cst_74 : f32 to vector<8x128xf32>
      %c0_75 = arith.constant 0 : index
      %c0_76 = arith.constant 0 : index
      %259 = vector.load %arg7[%c0_75, %c0_76] : memref<8x128xf32, #tpu.memory_space<vmem>>, vector<8x128xf32>
      tpu.vector_store %arg7[%c0_75, %c0_76], %258 {strides = array<i32>} : memref<8x128xf32, #tpu.memory_space<vmem>>, vector<8x128xf32>,
      %cst_77 = arith.constant 0.000000e+00 : f32
      %260 = vector.broadcast %cst_77 : f32 to vector<8x128xf32>
      %c0_78 = arith.constant 0 : index
      %c0_79 = arith.constant 0 : index
      %261 = vector.load %arg8[%c0_78, %c0_79] : memref<8x128xf32, #tpu.memory_space<vmem>>, vector<8x128xf32>
      tpu.vector_store %arg8[%c0_78, %c0_79], %260 {strides = array<i32>} : memref<8x128xf32, #tpu.memory_space<vmem>>, vector<8x128xf32>,
    } else {
    }
    %c0 = arith.constant 0 : index
    %c0_1 = arith.constant 0 : index
    %3 = vector.load %arg7[%c0, %c0_1] : memref<8x128xf32, #tpu.memory_space<vmem>>, vector<8x128xf32>
    %c0_2 = arith.constant 0 : index
    %c0_3 = arith.constant 0 : index
    %4 = vector.load %arg8[%c0_2, %c0_3] : memref<8x128xf32, #tpu.memory_space<vmem>>, vector<8x128xf32>
    %c0_i32_4 = arith.constant 0 : i32
    %5 = arith.index_cast %c0_i32_4 : i32 to index
    %c0_5 = arith.constant 0 : index
    %c0_6 = arith.constant 0 : index
    %6 = vector.load %arg2[%5, %c0_5, %c0_6] : memref<8x8x512xf32, #tpu.memory_space<vmem>>, vector<1x8x512xf32>
    %7 = vector.shape_cast %6 : vector<1x8x512xf32> to vector<8x512xf32>
    %c0_7 = arith.constant 0 : index
    %c0_8 = arith.constant 0 : index
    %8 = vector.load %arg3[%c0_7, %c0_8] : memref<128x512xf32, #tpu.memory_space<vmem>>, vector<128x512xf32>
    %cst = arith.constant dense<0.000000e+00> : vector<8x512xf32>
    %9 = tpu.matmul %3, %8, %cst {dimension_numbers = #tpu.dot_dimension_numbers<[1], [0], [0], [1], [0, 0, 1, 1], [], []>} : vector<8x128xf32>, vector<128x512xf32>, vector<8x512xf32> -> vector<8x512xf32>
    %10 = arith.addf %7, %9 : vector<8x512xf32>
    %11 = vector.extract_strided_slice %10 {offsets = [0, 0], sizes = [8, 128], strides = [1, 1]} : vector<8x512xf32> to vector<8x128xf32>
    %12 = arith.negf %11 : vector<8x128xf32>
    %13 = math.exp %12 : vector<8x128xf32>
    %cst_9 = arith.constant 1.000000e+00 : f32
    %14 = vector.broadcast %cst_9 : f32 to vector<8x128xf32>
    %15 = arith.addf %14, %13 : vector<8x128xf32>
    %16 = arith.divf %14, %15 : vector<8x128xf32>
    %17 = vector.extract_strided_slice %10 {offsets = [0, 128], sizes = [8, 128], strides = [1, 1]} : vector<8x512xf32> to vector<8x128xf32>
    %18 = arith.negf %17 : vector<8x128xf32>
    %19 = math.exp %18 : vector<8x128xf32>
    %cst_10 = arith.constant 1.000000e+00 : f32
    %20 = vector.broadcast %cst_10 : f32 to vector<8x128xf32>
    %21 = arith.addf %20, %19 : vector<8x128xf32>
    %22 = arith.divf %20, %21 : vector<8x128xf32>
    %23 = vector.extract_strided_slice %10 {offsets = [0, 256], sizes = [8, 128], strides = [1, 1]} : vector<8x512xf32> to vector<8x128xf32>
    %24 = math.tanh %23 : vector<8x128xf32>
    %25 = vector.extract_strided_slice %10 {offsets = [0, 384], sizes = [8, 128], strides = [1, 1]} : vector<8x512xf32> to vector<8x128xf32>
    %26 = arith.negf %25 : vector<8x128xf32>
    %27 = math.exp %26 : vector<8x128xf32>
    %cst_11 = arith.constant 1.000000e+00 : f32
    %28 = vector.broadcast %cst_11 : f32 to vector<8x128xf32>
    %29 = arith.addf %28, %27 : vector<8x128xf32>
    %30 = arith.divf %28, %29 : vector<8x128xf32>
    %31 = arith.mulf %22, %4 : vector<8x128xf32>
    %32 = arith.mulf %16, %24 : vector<8x128xf32>
    %33 = arith.addf %31, %32 : vector<8x128xf32>
    %34 = math.tanh %33 : vector<8x128xf32>
    %35 = arith.mulf %30, %34 : vector<8x128xf32>
    %c1_i32 = arith.constant 1 : i32
    %36 = arith.index_cast %c1_i32 : i32 to index
    %c0_12 = arith.constant 0 : index
    %c0_13 = arith.constant 0 : index
    %37 = vector.load %arg2[%36, %c0_12, %c0_13] : memref<8x8x512xf32, #tpu.memory_space<vmem>>, vector<1x8x512xf32>
    %38 = vector.shape_cast %37 : vector<1x8x512xf32> to vector<8x512xf32>
    %c0_14 = arith.constant 0 : index
    %c0_15 = arith.constant 0 : index
    %39 = vector.load %arg3[%c0_14, %c0_15] : memref<128x512xf32, #tpu.memory_space<vmem>>, vector<128x512xf32>
    %cst_16 = arith.constant dense<0.000000e+00> : vector<8x512xf32>
    %40 = tpu.matmul %35, %39, %cst_16 {dimension_numbers = #tpu.dot_dimension_numbers<[1], [0], [0], [1], [0, 0, 1, 1], [], []>} : vector<8x128xf32>, vector<128x512xf32>, vector<8x512xf32> -> vector<8x512xf32>
    %41 = arith.addf %38, %40 : vector<8x512xf32>
    %42 = vector.extract_strided_slice %41 {offsets = [0, 0], sizes = [8, 128], strides = [1, 1]} : vector<8x512xf32> to vector<8x128xf32>
    %43 = arith.negf %42 : vector<8x128xf32>
    %44 = math.exp %43 : vector<8x128xf32>
    %cst_17 = arith.constant 1.000000e+00 : f32
    %45 = vector.broadcast %cst_17 : f32 to vector<8x128xf32>
    %46 = arith.addf %45, %44 : vector<8x128xf32>
    %47 = arith.divf %45, %46 : vector<8x128xf32>
    %48 = vector.extract_strided_slice %41 {offsets = [0, 128], sizes = [8, 128], strides = [1, 1]} : vector<8x512xf32> to vector<8x128xf32>
    %49 = arith.negf %48 : vector<8x128xf32>
    %50 = math.exp %49 : vector<8x128xf32>
    %cst_18 = arith.constant 1.000000e+00 : f32
    %51 = vector.broadcast %cst_18 : f32 to vector<8x128xf32>
    %52 = arith.addf %51, %50 : vector<8x128xf32>
    %53 = arith.divf %51, %52 : vector<8x128xf32>
    %54 = vector.extract_strided_slice %41 {offsets = [0, 256], sizes = [8, 128], strides = [1, 1]} : vector<8x512xf32> to vector<8x128xf32>
    %55 = math.tanh %54 : vector<8x128xf32>
    %56 = vector.extract_strided_slice %41 {offsets = [0, 384], sizes = [8, 128], strides = [1, 1]} : vector<8x512xf32> to vector<8x128xf32>
    %57 = arith.negf %56 : vector<8x128xf32>
    %58 = math.exp %57 : vector<8x128xf32>
    %cst_19 = arith.constant 1.000000e+00 : f32
    %59 = vector.broadcast %cst_19 : f32 to vector<8x128xf32>
    %60 = arith.addf %59, %58 : vector<8x128xf32>
    %61 = arith.divf %59, %60 : vector<8x128xf32>
    %62 = arith.mulf %53, %33 : vector<8x128xf32>
    %63 = arith.mulf %47, %55 : vector<8x128xf32>
    %64 = arith.addf %62, %63 : vector<8x128xf32>
    %65 = math.tanh %64 : vector<8x128xf32>
    %66 = arith.mulf %61, %65 : vector<8x128xf32>
    %c2_i32 = arith.constant 2 : i32
    %67 = arith.index_cast %c2_i32 : i32 to index
    %c0_20 = arith.constant 0 : index
    %c0_21 = arith.constant 0 : index
    %68 = vector.load %arg2[%67, %c0_20, %c0_21] : memref<8x8x512xf32, #tpu.memory_space<vmem>>, vector<1x8x512xf32>
    %69 = vector.shape_cast %68 : vector<1x8x512xf32> to vector<8x512xf32>
    %c0_22 = arith.constant 0 : index
    %c0_23 = arith.constant 0 : index
    %70 = vector.load %arg3[%c0_22, %c0_23] : memref<128x512xf32, #tpu.memory_space<vmem>>, vector<128x512xf32>
    %cst_24 = arith.constant dense<0.000000e+00> : vector<8x512xf32>
    %71 = tpu.matmul %66, %70, %cst_24 {dimension_numbers = #tpu.dot_dimension_numbers<[1], [0], [0], [1], [0, 0, 1, 1], [], []>} : vector<8x128xf32>, vector<128x512xf32>, vector<8x512xf32> -> vector<8x512xf32>
    %72 = arith.addf %69, %71 : vector<8x512xf32>
    %73 = vector.extract_strided_slice %72 {offsets = [0, 0], sizes = [8, 128], strides = [1, 1]} : vector<8x512xf32> to vector<8x128xf32>
    %74 = arith.negf %73 : vector<8x128xf32>
    %75 = math.exp %74 : vector<8x128xf32>
    %cst_25 = arith.constant 1.000000e+00 : f32
    %76 = vector.broadcast %cst_25 : f32 to vector<8x128xf32>
    %77 = arith.addf %76, %75 : vector<8x128xf32>
    %78 = arith.divf %76, %77 : vector<8x128xf32>
    %79 = vector.extract_strided_slice %72 {offsets = [0, 128], sizes = [8, 128], strides = [1, 1]} : vector<8x512xf32> to vector<8x128xf32>
    %80 = arith.negf %79 : vector<8x128xf32>
    %81 = math.exp %80 : vector<8x128xf32>
    %cst_26 = arith.constant 1.000000e+00 : f32
    %82 = vector.broadcast %cst_26 : f32 to vector<8x128xf32>
    %83 = arith.addf %82, %81 : vector<8x128xf32>
    %84 = arith.divf %82, %83 : vector<8x128xf32>
    %85 = vector.extract_strided_slice %72 {offsets = [0, 256], sizes = [8, 128], strides = [1, 1]} : vector<8x512xf32> to vector<8x128xf32>
    %86 = math.tanh %85 : vector<8x128xf32>
    %87 = vector.extract_strided_slice %72 {offsets = [0, 384], sizes = [8, 128], strides = [1, 1]} : vector<8x512xf32> to vector<8x128xf32>
    %88 = arith.negf %87 : vector<8x128xf32>
    %89 = math.exp %88 : vector<8x128xf32>
    %cst_27 = arith.constant 1.000000e+00 : f32
    %90 = vector.broadcast %cst_27 : f32 to vector<8x128xf32>
    %91 = arith.addf %90, %89 : vector<8x128xf32>
    %92 = arith.divf %90, %91 : vector<8x128xf32>
    %93 = arith.mulf %84, %64 : vector<8x128xf32>
    %94 = arith.mulf %78, %86 : vector<8x128xf32>
    %95 = arith.addf %93, %94 : vector<8x128xf32>
    %96 = math.tanh %95 : vector<8x128xf32>
    %97 = arith.mulf %92, %96 : vector<8x128xf32>
    %c3_i32 = arith.constant 3 : i32
    %98 = arith.index_cast %c3_i32 : i32 to index
    %c0_28 = arith.constant 0 : index
    %c0_29 = arith.constant 0 : index
    %99 = vector.load %arg2[%98, %c0_28, %c0_29] : memref<8x8x512xf32, #tpu.memory_space<vmem>>, vector<1x8x512xf32>
    %100 = vector.shape_cast %99 : vector<1x8x512xf32> to vector<8x512xf32>
    %c0_30 = arith.constant 0 : index
    %c0_31 = arith.constant 0 : index
    %101 = vector.load %arg3[%c0_30, %c0_31] : memref<128x512xf32, #tpu.memory_space<vmem>>, vector<128x512xf32>
    %cst_32 = arith.constant dense<0.000000e+00> : vector<8x512xf32>
    %102 = tpu.matmul %97, %101, %cst_32 {dimension_numbers = #tpu.dot_dimension_numbers<[1], [0], [0], [1], [0, 0, 1, 1], [], []>} : vector<8x128xf32>, vector<128x512xf32>, vector<8x512xf32> -> vector<8x512xf32>
    %103 = arith.addf %100, %102 : vector<8x512xf32>
    %104 = vector.extract_strided_slice %103 {offsets = [0, 0], sizes = [8, 128], strides = [1, 1]} : vector<8x512xf32> to vector<8x128xf32>
    %105 = arith.negf %104 : vector<8x128xf32>
    %106 = math.exp %105 : vector<8x128xf32>
    %cst_33 = arith.constant 1.000000e+00 : f32
    %107 = vector.broadcast %cst_33 : f32 to vector<8x128xf32>
    %108 = arith.addf %107, %106 : vector<8x128xf32>
    %109 = arith.divf %107, %108 : vector<8x128xf32>
    %110 = vector.extract_strided_slice %103 {offsets = [0, 128], sizes = [8, 128], strides = [1, 1]} : vector<8x512xf32> to vector<8x128xf32>
    %111 = arith.negf %110 : vector<8x128xf32>
    %112 = math.exp %111 : vector<8x128xf32>
    %cst_34 = arith.constant 1.000000e+00 : f32
    %113 = vector.broadcast %cst_34 : f32 to vector<8x128xf32>
    %114 = arith.addf %113, %112 : vector<8x128xf32>
    %115 = arith.divf %113, %114 : vector<8x128xf32>
    %116 = vector.extract_strided_slice %103 {offsets = [0, 256], sizes = [8, 128], strides = [1, 1]} : vector<8x512xf32> to vector<8x128xf32>
    %117 = math.tanh %116 : vector<8x128xf32>
    %118 = vector.extract_strided_slice %103 {offsets = [0, 384], sizes = [8, 128], strides = [1, 1]} : vector<8x512xf32> to vector<8x128xf32>
    %119 = arith.negf %118 : vector<8x128xf32>
    %120 = math.exp %119 : vector<8x128xf32>
    %cst_35 = arith.constant 1.000000e+00 : f32
    %121 = vector.broadcast %cst_35 : f32 to vector<8x128xf32>
    %122 = arith.addf %121, %120 : vector<8x128xf32>
    %123 = arith.divf %121, %122 : vector<8x128xf32>
    %124 = arith.mulf %115, %95 : vector<8x128xf32>
    %125 = arith.mulf %109, %117 : vector<8x128xf32>
    %126 = arith.addf %124, %125 : vector<8x128xf32>
    %127 = math.tanh %126 : vector<8x128xf32>
    %128 = arith.mulf %123, %127 : vector<8x128xf32>
    %c4_i32 = arith.constant 4 : i32
    %129 = arith.index_cast %c4_i32 : i32 to index
    %c0_36 = arith.constant 0 : index
    %c0_37 = arith.constant 0 : index
    %130 = vector.load %arg2[%129, %c0_36, %c0_37] : memref<8x8x512xf32, #tpu.memory_space<vmem>>, vector<1x8x512xf32>
    %131 = vector.shape_cast %130 : vector<1x8x512xf32> to vector<8x512xf32>
    %c0_38 = arith.constant 0 : index
    %c0_39 = arith.constant 0 : index
    %132 = vector.load %arg3[%c0_38, %c0_39] : memref<128x512xf32, #tpu.memory_space<vmem>>, vector<128x512xf32>
    %cst_40 = arith.constant dense<0.000000e+00> : vector<8x512xf32>
    %133 = tpu.matmul %128, %132, %cst_40 {dimension_numbers = #tpu.dot_dimension_numbers<[1], [0], [0], [1], [0, 0, 1, 1], [], []>} : vector<8x128xf32>, vector<128x512xf32>, vector<8x512xf32> -> vector<8x512xf32>
    %134 = arith.addf %131, %133 : vector<8x512xf32>
    %135 = vector.extract_strided_slice %134 {offsets = [0, 0], sizes = [8, 128], strides = [1, 1]} : vector<8x512xf32> to vector<8x128xf32>
    %136 = arith.negf %135 : vector<8x128xf32>
    %137 = math.exp %136 : vector<8x128xf32>
    %cst_41 = arith.constant 1.000000e+00 : f32
    %138 = vector.broadcast %cst_41 : f32 to vector<8x128xf32>
    %139 = arith.addf %138, %137 : vector<8x128xf32>
    %140 = arith.divf %138, %139 : vector<8x128xf32>
    %141 = vector.extract_strided_slice %134 {offsets = [0, 128], sizes = [8, 128], strides = [1, 1]} : vector<8x512xf32> to vector<8x128xf32>
    %142 = arith.negf %141 : vector<8x128xf32>
    %143 = math.exp %142 : vector<8x128xf32>
    %cst_42 = arith.constant 1.000000e+00 : f32
    %144 = vector.broadcast %cst_42 : f32 to vector<8x128xf32>
    %145 = arith.addf %144, %143 : vector<8x128xf32>
    %146 = arith.divf %144, %145 : vector<8x128xf32>
    %147 = vector.extract_strided_slice %134 {offsets = [0, 256], sizes = [8, 128], strides = [1, 1]} : vector<8x512xf32> to vector<8x128xf32>
    %148 = math.tanh %147 : vector<8x128xf32>
    %149 = vector.extract_strided_slice %134 {offsets = [0, 384], sizes = [8, 128], strides = [1, 1]} : vector<8x512xf32> to vector<8x128xf32>
    %150 = arith.negf %149 : vector<8x128xf32>
    %151 = math.exp %150 : vector<8x128xf32>
    %cst_43 = arith.constant 1.000000e+00 : f32
    %152 = vector.broadcast %cst_43 : f32 to vector<8x128xf32>
    %153 = arith.addf %152, %151 : vector<8x128xf32>
    %154 = arith.divf %152, %153 : vector<8x128xf32>
    %155 = arith.mulf %146, %126 : vector<8x128xf32>
    %156 = arith.mulf %140, %148 : vector<8x128xf32>
    %157 = arith.addf %155, %156 : vector<8x128xf32>
    %158 = math.tanh %157 : vector<8x128xf32>
    %159 = arith.mulf %154, %158 : vector<8x128xf32>
    %c5_i32 = arith.constant 5 : i32
    %160 = arith.index_cast %c5_i32 : i32 to index
    %c0_44 = arith.constant 0 : index
    %c0_45 = arith.constant 0 : index
    %161 = vector.load %arg2[%160, %c0_44, %c0_45] : memref<8x8x512xf32, #tpu.memory_space<vmem>>, vector<1x8x512xf32>
    %162 = vector.shape_cast %161 : vector<1x8x512xf32> to vector<8x512xf32>
    %c0_46 = arith.constant 0 : index
    %c0_47 = arith.constant 0 : index
    %163 = vector.load %arg3[%c0_46, %c0_47] : memref<128x512xf32, #tpu.memory_space<vmem>>, vector<128x512xf32>
    %cst_48 = arith.constant dense<0.000000e+00> : vector<8x512xf32>
    %164 = tpu.matmul %159, %163, %cst_48 {dimension_numbers = #tpu.dot_dimension_numbers<[1], [0], [0], [1], [0, 0, 1, 1], [], []>} : vector<8x128xf32>, vector<128x512xf32>, vector<8x512xf32> -> vector<8x512xf32>
    %165 = arith.addf %162, %164 : vector<8x512xf32>
    %166 = vector.extract_strided_slice %165 {offsets = [0, 0], sizes = [8, 128], strides = [1, 1]} : vector<8x512xf32> to vector<8x128xf32>
    %167 = arith.negf %166 : vector<8x128xf32>
    %168 = math.exp %167 : vector<8x128xf32>
    %cst_49 = arith.constant 1.000000e+00 : f32
    %169 = vector.broadcast %cst_49 : f32 to vector<8x128xf32>
    %170 = arith.addf %169, %168 : vector<8x128xf32>
    %171 = arith.divf %169, %170 : vector<8x128xf32>
    %172 = vector.extract_strided_slice %165 {offsets = [0, 128], sizes = [8, 128], strides = [1, 1]} : vector<8x512xf32> to vector<8x128xf32>
    %173 = arith.negf %172 : vector<8x128xf32>
    %174 = math.exp %173 : vector<8x128xf32>
    %cst_50 = arith.constant 1.000000e+00 : f32
    %175 = vector.broadcast %cst_50 : f32 to vector<8x128xf32>
    %176 = arith.addf %175, %174 : vector<8x128xf32>
    %177 = arith.divf %175, %176 : vector<8x128xf32>
    %178 = vector.extract_strided_slice %165 {offsets = [0, 256], sizes = [8, 128], strides = [1, 1]} : vector<8x512xf32> to vector<8x128xf32>
    %179 = math.tanh %178 : vector<8x128xf32>
    %180 = vector.extract_strided_slice %165 {offsets = [0, 384], sizes = [8, 128], strides = [1, 1]} : vector<8x512xf32> to vector<8x128xf32>
    %181 = arith.negf %180 : vector<8x128xf32>
    %182 = math.exp %181 : vector<8x128xf32>
    %cst_51 = arith.constant 1.000000e+00 : f32
    %183 = vector.broadcast %cst_51 : f32 to vector<8x128xf32>
    %184 = arith.addf %183, %182 : vector<8x128xf32>
    %185 = arith.divf %183, %184 : vector<8x128xf32>
    %186 = arith.mulf %177, %157 : vector<8x128xf32>
    %187 = arith.mulf %171, %179 : vector<8x128xf32>
    %188 = arith.addf %186, %187 : vector<8x128xf32>
    %189 = math.tanh %188 : vector<8x128xf32>
    %190 = arith.mulf %185, %189 : vector<8x128xf32>
    %c6_i32 = arith.constant 6 : i32
    %191 = arith.index_cast %c6_i32 : i32 to index
    %c0_52 = arith.constant 0 : index
    %c0_53 = arith.constant 0 : index
    %192 = vector.load %arg2[%191, %c0_52, %c0_53] : memref<8x8x512xf32, #tpu.memory_space<vmem>>, vector<1x8x512xf32>
    %193 = vector.shape_cast %192 : vector<1x8x512xf32> to vector<8x512xf32>
    %c0_54 = arith.constant 0 : index
    %c0_55 = arith.constant 0 : index
    %194 = vector.load %arg3[%c0_54, %c0_55] : memref<128x512xf32, #tpu.memory_space<vmem>>, vector<128x512xf32>
    %cst_56 = arith.constant dense<0.000000e+00> : vector<8x512xf32>
    %195 = tpu.matmul %190, %194, %cst_56 {dimension_numbers = #tpu.dot_dimension_numbers<[1], [0], [0], [1], [0, 0, 1, 1], [], []>} : vector<8x128xf32>, vector<128x512xf32>, vector<8x512xf32> -> vector<8x512xf32>
    %196 = arith.addf %193, %195 : vector<8x512xf32>
    %197 = vector.extract_strided_slice %196 {offsets = [0, 0], sizes = [8, 128], strides = [1, 1]} : vector<8x512xf32> to vector<8x128xf32>
    %198 = arith.negf %197 : vector<8x128xf32>
    %199 = math.exp %198 : vector<8x128xf32>
    %cst_57 = arith.constant 1.000000e+00 : f32
    %200 = vector.broadcast %cst_57 : f32 to vector<8x128xf32>
    %201 = arith.addf %200, %199 : vector<8x128xf32>
    %202 = arith.divf %200, %201 : vector<8x128xf32>
    %203 = vector.extract_strided_slice %196 {offsets = [0, 128], sizes = [8, 128], strides = [1, 1]} : vector<8x512xf32> to vector<8x128xf32>
    %204 = arith.negf %203 : vector<8x128xf32>
    %205 = math.exp %204 : vector<8x128xf32>
    %cst_58 = arith.constant 1.000000e+00 : f32
    %206 = vector.broadcast %cst_58 : f32 to vector<8x128xf32>
    %207 = arith.addf %206, %205 : vector<8x128xf32>
    %208 = arith.divf %206, %207 : vector<8x128xf32>
    %209 = vector.extract_strided_slice %196 {offsets = [0, 256], sizes = [8, 128], strides = [1, 1]} : vector<8x512xf32> to vector<8x128xf32>
    %210 = math.tanh %209 : vector<8x128xf32>
    %211 = vector.extract_strided_slice %196 {offsets = [0, 384], sizes = [8, 128], strides = [1, 1]} : vector<8x512xf32> to vector<8x128xf32>
    %212 = arith.negf %211 : vector<8x128xf32>
    %213 = math.exp %212 : vector<8x128xf32>
    %cst_59 = arith.constant 1.000000e+00 : f32
    %214 = vector.broadcast %cst_59 : f32 to vector<8x128xf32>
    %215 = arith.addf %214, %213 : vector<8x128xf32>
    %216 = arith.divf %214, %215 : vector<8x128xf32>
    %217 = arith.mulf %208, %188 : vector<8x128xf32>
    %218 = arith.mulf %202, %210 : vector<8x128xf32>
    %219 = arith.addf %217, %218 : vector<8x128xf32>
    %220 = math.tanh %219 : vector<8x128xf32>
    %221 = arith.mulf %216, %220 : vector<8x128xf32>
    %c7_i32 = arith.constant 7 : i32
    %222 = arith.index_cast %c7_i32 : i32 to index
    %c0_60 = arith.constant 0 : index
    %c0_61 = arith.constant 0 : index
    %223 = vector.load %arg2[%222, %c0_60, %c0_61] : memref<8x8x512xf32, #tpu.memory_space<vmem>>, vector<1x8x512xf32>
    %224 = vector.shape_cast %223 : vector<1x8x512xf32> to vector<8x512xf32>
    %c0_62 = arith.constant 0 : index
    %c0_63 = arith.constant 0 : index
    %225 = vector.load %arg3[%c0_62, %c0_63] : memref<128x512xf32, #tpu.memory_space<vmem>>, vector<128x512xf32>
    %cst_64 = arith.constant dense<0.000000e+00> : vector<8x512xf32>
    %226 = tpu.matmul %221, %225, %cst_64 {dimension_numbers = #tpu.dot_dimension_numbers<[1], [0], [0], [1], [0, 0, 1, 1], [], []>} : vector<8x128xf32>, vector<128x512xf32>, vector<8x512xf32> -> vector<8x512xf32>
    %227 = arith.addf %224, %226 : vector<8x512xf32>
    %228 = vector.extract_strided_slice %227 {offsets = [0, 0], sizes = [8, 128], strides = [1, 1]} : vector<8x512xf32> to vector<8x128xf32>
    %229 = arith.negf %228 : vector<8x128xf32>
    %230 = math.exp %229 : vector<8x128xf32>
    %cst_65 = arith.constant 1.000000e+00 : f32
    %231 = vector.broadcast %cst_65 : f32 to vector<8x128xf32>
    %232 = arith.addf %231, %230 : vector<8x128xf32>
    %233 = arith.divf %231, %232 : vector<8x128xf32>
    %234 = vector.extract_strided_slice %227 {offsets = [0, 128], sizes = [8, 128], strides = [1, 1]} : vector<8x512xf32> to vector<8x128xf32>
    %235 = arith.negf %234 : vector<8x128xf32>
    %236 = math.exp %235 : vector<8x128xf32>
    %cst_66 = arith.constant 1.000000e+00 : f32
    %237 = vector.broadcast %cst_66 : f32 to vector<8x128xf32>
    %238 = arith.addf %237, %236 : vector<8x128xf32>
    %239 = arith.divf %237, %238 : vector<8x128xf32>
    %240 = vector.extract_strided_slice %227 {offsets = [0, 256], sizes = [8, 128], strides = [1, 1]} : vector<8x512xf32> to vector<8x128xf32>
    %241 = math.tanh %240 : vector<8x128xf32>
    %242 = vector.extract_strided_slice %227 {offsets = [0, 384], sizes = [8, 128], strides = [1, 1]} : vector<8x512xf32> to vector<8x128xf32>
    %243 = arith.negf %242 : vector<8x128xf32>
    %244 = math.exp %243 : vector<8x128xf32>
    %cst_67 = arith.constant 1.000000e+00 : f32
    %245 = vector.broadcast %cst_67 : f32 to vector<8x128xf32>
    %246 = arith.addf %245, %244 : vector<8x128xf32>
    %247 = arith.divf %245, %246 : vector<8x128xf32>
    %248 = arith.mulf %239, %219 : vector<8x128xf32>
    %249 = arith.mulf %233, %241 : vector<8x128xf32>
    %250 = arith.addf %248, %249 : vector<8x128xf32>
    %251 = math.tanh %250 : vector<8x128xf32>
    %252 = arith.mulf %247, %251 : vector<8x128xf32>
    %c8_i32 = arith.constant 8 : i32
    %c0_68 = arith.constant 0 : index
    %c0_69 = arith.constant 0 : index
    %253 = vector.load %arg7[%c0_68, %c0_69] : memref<8x128xf32, #tpu.memory_space<vmem>>, vector<8x128xf32>
    tpu.vector_store %arg7[%c0_68, %c0_69], %252 {strides = array<i32>} : memref<8x128xf32, #tpu.memory_space<vmem>>, vector<8x128xf32>,
    %c0_70 = arith.constant 0 : index
    %c0_71 = arith.constant 0 : index
    %254 = vector.load %arg8[%c0_70, %c0_71] : memref<8x128xf32, #tpu.memory_space<vmem>>, vector<8x128xf32>
    tpu.vector_store %arg8[%c0_70, %c0_71], %250 {strides = array<i32>} : memref<8x128xf32, #tpu.memory_space<vmem>>, vector<8x128xf32>,
    %c0_i32_72 = arith.constant 0 : i32
    %255 = arith.cmpi eq, %arg1, %c0_i32_72 : i32
    %256 = arith.extui %255 : i1 to i32
    %c0_i32_73 = arith.constant 0 : i32
    %257 = arith.cmpi ne, %256, %c0_i32_73 : i32
    scf.if %257 {
      %c0_74 = arith.constant 0 : index
      %c0_75 = arith.constant 0 : index
      %258 = vector.load %arg4[%c0_74, %c0_75] : memref<128x128xf32, #tpu.memory_space<vmem>>, vector<128x128xf32>
      %cst_76 = arith.constant dense<0.000000e+00> : vector<8x128xf32>
      %259 = tpu.matmul %252, %258, %cst_76 {dimension_numbers = #tpu.dot_dimension_numbers<[1], [0], [0], [1], [0, 0, 1, 1], [], []>} : vector<8x128xf32>, vector<128x128xf32>, vector<8x128xf32> -> vector<8x128xf32>
      %c0_77 = arith.constant 0 : index
      %c0_78 = arith.constant 0 : index
      %260 = vector.load %arg5[%c0_77, %c0_78] : memref<1x128xf32, #tpu.memory_space<vmem>>, vector<1x128xf32>
      %261 = vector.broadcast %260 : vector<1x128xf32> to vector<8x128xf32>
      %262 = arith.addf %259, %261 : vector<8x128xf32>
      %c0_79 = arith.constant 0 : index
      %c0_80 = arith.constant 0 : index
      %263 = vector.load %arg6[%c0_79, %c0_80] : memref<8x128xf32, #tpu.memory_space<vmem>>, vector<8x128xf32>
      tpu.vector_store %arg6[%c0_79, %c0_80], %262 {strides = array<i32>} : memref<8x128xf32, #tpu.memory_space<vmem>>, vector<8x128xf32>,
    } else {
    }
    return
  }
  func.func @transform_0(%arg0: i32, %arg1: i32) -> (i32, i32, i32) {
    %c0_i32 = arith.constant 0 : i32
    %c0_i32_0 = arith.constant 0 : i32
    return %arg1, %arg0, %c0_i32 : i32, i32, i32
  }
  func.func @transform_1(%arg0: i32, %arg1: i32) -> (i32, i32) {
    %c0_i32 = arith.constant 0 : i32
    %c0_i32_0 = arith.constant 0 : i32
    %c0_i32_1 = arith.constant 0 : i32
    return %c0_i32, %c0_i32_0 : i32, i32
  }
  func.func @transform_2(%arg0: i32, %arg1: i32) -> (i32, i32) {
    %c0_i32 = arith.constant 0 : i32
    %c0_i32_0 = arith.constant 0 : i32
    %c0_i32_1 = arith.constant 0 : i32
    return %c0_i32, %c0_i32_0 : i32, i32
  }
  func.func @transform_3(%arg0: i32, %arg1: i32) -> (i32, i32) {
    %c0_i32 = arith.constant 0 : i32
    %c0_i32_0 = arith.constant 0 : i32
    %c0_i32_1 = arith.constant 0 : i32
    return %c0_i32, %c0_i32_0 : i32, i32
  }
  func.func @transform_4(%arg0: i32, %arg1: i32) -> (i32, i32) {
    %c0_i32 = arith.constant 0 : i32
    %c0_i32_0 = arith.constant 0 : i32
    return %arg0, %c0_i32 : i32, i32
  }
}

</mosaic_0001>

<bundles_post_ra>
// kernel: crnn_forward.2
= control target key start
LH: loop header
LB: loop body
LE: loop exit
PB: predicated region body
PF: predicated region fallthrough
CT: control target
= control target key end

     0   :  { %vm38_vm0 = vcmask 162816   ;;  %vm63_vm1 = vcmask 1043456   ;;  %s1052_s1 = inlined_call_operand.vmem [shape: f32[20,128], index: 1, kind: input, shape index: {}]   ;;  %s1053_s0 = inlined_call_operand.vmem [shape: f32[64,20], index: 0, kind: input, shape index: {}]   ;;  %s1054_s3 = inlined_call_operand.vmem [shape: f32[128,512], index: 3, kind: input, shape index: {}]   ;;  %s1055_s2 = inlined_call_operand.vmem [shape: f32[1,128], index: 2, kind: input, shape index: {}]   ;;  %s1056_s4 = inlined_call_operand.vmem [shape: f32[1,512], index: 4, kind: input, shape index: {}]   ;;  %s1057_s5 = inlined_call_operand.vmem [shape: f32[64,512], index: 5, kind: output, shape index: {}]  }
   0x1   :  { %v28_v0 = vld [vmem:[%s1052_s1] sm:$0xff]  ;;  %v29_v1 = vld [vmem:[%s1052_s1 + $0x8] sm:$0xff]  ;;  %v30_v4 = vld [vmem:[%s1052_s1 + $0x10] sm:$0xf] }
   0x2   :  { %v575_v2 = vpack.c.bf16 %v29_v1, %v28_v0  ;;  %v20_v3 = vld [vmem:[%s1053_s0] sm:$0xff]  ;;  %v189_v5 = vld [vmem:[%s1054_s3 + $0x8] sm:$0xff]  ;;  %v191_v8 = vld [vmem:[%s1054_s3 + $0x18] sm:$0xff] }
   0x3   :  { %563 = vmatprep.mubr.msk.f32.mxu0 %vm38_vm0, %v20_v3  ;;  %v21_v6 = vld [vmem:[%s1053_s0 + $0x8] sm:$0xff]  ;;  %v195_v9 = vld [vmem:[%s1054_s3 + $0x38] sm:$0xff]  ;;  %v22_v10 = vld [vmem:[%s1053_s0 + $0x10] sm:$0xff] }
   0x4   :  { %576 = vmatprep.subr.bf16.mxu0 %v575_v2  ;;  %v193_v7 = vld [vmem:[%s1054_s3 + $0x28] sm:$0xff]  ;;  %v611_v12 = vpack.c.bf16 %v195_v9, %v191_v8  ;;  %v188_v13 = vld [vmem:[%s1054_s3] sm:$0xff]  ;;  %v190_v15 = vld [vmem:[%s1054_s3 + $0x10] sm:$0xff] }
   0x5   :  { %578 = vmatpush3.bf16.msra.mxu0 %v575_v2  ;;  %v579_v11 = vpack.c.bf16 %v193_v7, %v189_v5  ;;  %v192_v14 = vld [vmem:[%s1054_s3 + $0x20] sm:$0xff]  ;;  %v194_v17 = vld [vmem:[%s1054_s3 + $0x30] sm:$0xff]  ;;  %v197_v18 = vld [vmem:[%s1054_s3 + $0x48] sm:$0xff] }
   0x6   :  { %561 = vmatprep.subr.msk.mxu0 %vm63_vm1, %v30_v4  ;;  %v581_v16 = vpack.c.bf16 %v192_v14, %v188_v13  ;;  %v201_v19 = vld [vmem:[%s1054_s3 + $0x68] sm:$0xff]  ;;  %v613_v20 = vpack.c.bf16 %v194_v17, %v190_v15  ;;  %v199_v22 = vld [vmem:[%s1054_s3 + $0x58] sm:$0xff]  ;;  %v196_v24 = vld [vmem:[%s1054_s3 + $0x40] sm:$0xff] }
   0x7   :  { %580 = vmatprep.subr.bf16.mxu1 %v579_v11  ;;  %v583_v21 = vpack.c.bf16 %v201_v19, %v197_v18  ;;  %v203_v23 = vld [vmem:[%s1054_s3 + $0x78] sm:$0xff]  ;;  %v200_v27 = vld [vmem:[%s1054_s3 + $0x60] sm:$0xff]  ;;  %v198_v28 = vld [vmem:[%s1054_s3 + $0x50] sm:$0xff] }
   0x8   :  { %v23_v25 = vld [vmem:[%s1053_s0 + $0x18] sm:$0xff]  ;;  %582 = vmatpush1.bf16.msra.mxu1 %v581_v16  ;;  %v615_v26 = vpack.c.bf16 %v203_v23, %v199_v22  ;;  %v202_v29 = vld [vmem:[%s1054_s3 + $0x70] sm:$0xff]  ;;  %v24_v30 = vld [vmem:[%s1053_s0 + $0x20] sm:$0xff]  ;;  %v585_v31 = vpack.c.bf16 %v200_v27, %v196_v24 }
   0x9   :  { %562 = vmatpush3.msk.msra.mxu0 %vm63_vm1, %v30_v4  ;;  %v205_v32 = vld [vmem:[%s1054_s3 + $0x88] sm:$0xff]  ;;  %v207_v34 = vld [vmem:[%s1054_s3 + $0x98] sm:$0xff]  ;;  %v617_v35 = vpack.c.bf16 %v202_v29, %v198_v28  ;;  %v204_v38 = vld [vmem:[%s1054_s3 + $0x80] sm:$0xff]  ;;  %584 = vmatprep.subr.bf16.mxu1 %v583_v21 }
   0xa   :  { %564 = vmatmul.mubr.msk.f32.vlgmr.msra.gmra.mrb[0].mxu0 %vm38_vm0, %v21_v6  ;;  %612 = vmatprep.subr.bf16.mxu0 %v611_v12  ;;  %v209_v33 = vld [vmem:[%s1054_s3 + $0xa8] sm:$0xff]  ;;  %v211_v37 = vld [vmem:[%s1054_s3 + $0xb8] sm:$0xff]  ;;  %v208_v39 = vld [vmem:[%s1054_s3 + $0xa0] sm:$0xff] }
   0xb   :  { %566 = vmatprep.mubr.msk.f32.mxu0 %vm38_vm0, %v22_v10  ;;  %614 = vmatpush1.bf16.msra.mxu0 %v613_v20  ;;  %v587_v36 = vpack.c.bf16 %v209_v33, %v205_v32  ;;  %v619_v40 = vpack.c.bf16 %v211_v37, %v207_v34  ;;  %v206_v41 = vld [vmem:[%s1054_s3 + $0x90] sm:$0xff]  ;;  %v213_v43 = vld [vmem:[%s1054_s3 + $0xc8] sm:$0xff]  ;;  %v589_v44 = vpack.c.bf16 %v208_v39, %v204_v38  ;;  %v215_v46 = vld [vmem:[%s1054_s3 + $0xd8] sm:$0xff] }
   0xc   :  { %616 = vmatprep.subr.bf16.mxu0 %v615_v26  ;;  %v210_v42 = vld [vmem:[%s1054_s3 + $0xb0] sm:$0xff]  ;;  %586 = vmatpush1.bf16.msra.mxu1 %v585_v31  ;;  %v217_v45 = vld [vmem:[%s1054_s3 + $0xe8] sm:$0xff]  ;;  %v219_v47 = vld [vmem:[%s1054_s3 + $0xf8] sm:$0xff] }
   0xd   :  { %588 = vmatprep.subr.bf16.mxu1 %v587_v36  ;;  %v591_v48 = vpack.c.bf16 %v217_v45, %v213_v43  ;;  %v212_v49 = vld [vmem:[%s1054_s3 + $0xc0] sm:$0xff]  ;;  %v25_v51 = vld [vmem:[%s1053_s0 + $0x28] sm:$0xff]  ;;  %v621_v52 = vpack.c.bf16 %v210_v42, %v206_v41  ;;  %v26_v55 = vld [vmem:[%s1053_s0 + $0x30] sm:$0xff]  ;;  %v623_v56 = vpack.c.bf16 %v219_v47, %v215_v46 }
   0xe   :  { %567 = vmatmul.mubr.msk.f32.gmra.mrb[2].mxu0 %vm38_vm0, %v23_v25  ;;  %v216_v50 = vld [vmem:[%s1054_s3 + $0xe0] sm:$0xff]  ;;  %v221_v53 = vld [vmem:[%s1054_s3 + $0x108] sm:$0xff]  ;;  %v214_v57 = vld [vmem:[%s1054_s3 + $0xd0] sm:$0xff] }
   0xf   :  { %569 = vmatprep.mubr.msk.f32.mxu0 %vm38_vm0, %v24_v30  ;;  %618 = vmatpush1.bf16.msra.mxu0 %v617_v35  ;;  %v225_v54 = vld [vmem:[%s1054_s3 + $0x128] sm:$0xff]  ;;  %v218_v58 = vld [vmem:[%s1054_s3 + $0xf0] sm:$0xff]  ;;  %v593_v59 = vpack.c.bf16 %v216_v50, %v212_v49  ;;  %v223_v60 = vld [vmem:[%s1054_s3 + $0x118] sm:$0xff] }
  0x10   :  { %620 = vmatprep.subr.bf16.mxu0 %v619_v40  ;;  %590 = vmatpush1.bf16.msra.mxu1 %v589_v44  ;;  %v227_v61 = vld [vmem:[%s1054_s3 + $0x138] sm:$0xff]  ;;  %v595_v62 = vpack.c.bf16 %v225_v54, %v221_v53  ;;  %v220_v63 = vld [vmem:[%s1054_s3 + $0x100] sm:$0xff]  ;;  %v625_v2 = vpack.c.bf16 %v218_v58, %v214_v57  ;;  %v229_v3 = vld [vmem:[%s1054_s3 + $0x148] sm:$0xff]  ;;  %v644_v44 = vmov 0.0  }
  0x11   :  { %592 = vmatprep.subr.bf16.mxu1 %v591_v48  ;;  %v224_v0 = vld [vmem:[%s1054_s3 + $0x120] sm:$0xff]  ;;  %v27_v1 = vld [vmem:[%s1053_s0 + $0x38] sm:$0xff]  ;;  %v233_v4 = vld [vmem:[%s1054_s3 + $0x168] sm:$0xff]  ;;  %v627_v5 = vpack.c.bf16 %v227_v61, %v223_v60  ;;  %338 = vmatprep.mubr.f32.mxu1 %v644_v44 }
  0x12   :  { %570 = vmatmul.mubr.msk.f32.gmra.mrb[4].mxu0 %vm38_vm0, %v25_v51  ;;  %v222_v6 = vld [vmem:[%s1054_s3 + $0x110] sm:$0xff]  ;;  %v597_v8 = vpack.c.bf16 %v224_v0, %v220_v63  ;;  %v231_v9 = vld [vmem:[%s1054_s3 + $0x158] sm:$0xff]  ;;  %v599_v11 = vpack.c.bf16 %v233_v4, %v229_v3  ;;  %v228_v12 = vld [vmem:[%s1054_s3 + $0x140] sm:$0xff] }
  0x13   :  { %572 = vmatprep.mubr.msk.f32.mxu0 %vm38_vm0, %v26_v55  ;;  %622 = vmatpush1.bf16.msra.mxu0 %v621_v52  ;;  %v226_v7 = vld [vmem:[%s1054_s3 + $0x130] sm:$0xff]  ;;  %v235_v10 = vld [vmem:[%s1054_s3 + $0x178] sm:$0xff]  ;;  %v232_v13 = vld [vmem:[%s1054_s3 + $0x160] sm:$0xff] }
  0x14   :  { %624 = vmatprep.subr.bf16.mxu0 %v623_v56  ;;  %594 = vmatpush1.bf16.msra.mxu1 %v593_v59  ;;  %v629_v14 = vpack.c.bf16 %v226_v7, %v222_v6  ;;  %v631_v15 = vpack.c.bf16 %v235_v10, %v231_v9  ;;  %v230_v16 = vld [vmem:[%s1054_s3 + $0x150] sm:$0xff]  ;;  %v601_v18 = vpack.c.bf16 %v232_v13, %v228_v12  ;;  %v237_v20 = vld [vmem:[%s1054_s3 + $0x188] sm:$0xff]  ;;  %v239_v22 = vld [vmem:[%s1054_s3 + $0x198] sm:$0xff] }
  0x15   :  { %596 = vmatprep.subr.bf16.mxu1 %v595_v62  ;;  %v234_v17 = vld [vmem:[%s1054_s3 + $0x170] sm:$0xff]  ;;  %v241_v21 = vld [vmem:[%s1054_s3 + $0x1a8] sm:$0xff]  ;;  %v243_v24 = vld [vmem:[%s1054_s3 + $0x1b8] sm:$0xff] }
  0x16   :  { %573 = vmatmul.mubr.msk.f32.gmra.mrb[6].mxu0 %vm38_vm0, %v27_v1  ;;  %v633_v19 = vpack.c.bf16 %v234_v17, %v230_v16  ;;  %v603_v23 = vpack.c.bf16 %v241_v21, %v237_v20  ;;  %v236_v25 = vld [vmem:[%s1054_s3 + $0x180] sm:$0xff]  ;;  %v635_v27 = vpack.c.bf16 %v243_v24, %v239_v22  ;;  %v238_v29 = vld [vmem:[%s1054_s3 + $0x190] sm:$0xff]  ;;  %v245_v32 = vld [vmem:[%s1054_s3 + $0x1c8] sm:$0xff] }
  0x17   :  { %626 = vmatpush1.bf16.msra.mxu0 %v625_v2  ;;  %v240_v26 = vld [vmem:[%s1054_s3 + $0x1a0] sm:$0xff]  ;;  %v242_v30 = vld [vmem:[%s1054_s3 + $0x1b0] sm:$0xff]  ;;  %v249_v33 = vld [vmem:[%s1054_s3 + $0x1e8] sm:$0xff]  ;;  %451 = vmatprep.mubr.f32.mxu0 %v644_v44 }
  0x18   :  { %628 = vmatprep.subr.bf16.mxu0 %v627_v5  ;;  %598 = vmatpush1.bf16.msra.mxu1 %v597_v8  ;;  %v605_v28 = vpack.c.bf16 %v240_v26, %v236_v25  ;;  %v637_v31 = vpack.c.bf16 %v242_v30, %v238_v29  ;;  %v247_v34 = vld [vmem:[%s1054_s3 + $0x1d8] sm:$0xff]  ;;  %v607_v35 = vpack.c.bf16 %v249_v33, %v245_v32  ;;  %v244_v37 = vld [vmem:[%s1054_s3 + $0x1c0] sm:$0xff]  ;;  %v246_v41 = vld [vmem:[%s1054_s3 + $0x1d0] sm:$0xff] }
  0x19   :  { %600 = vmatprep.subr.bf16.mxu1 %v599_v11  ;;  %v251_v36 = vld [vmem:[%s1054_s3 + $0x1f8] sm:$0xff]  ;;  %v248_v38 = vld [vmem:[%s1054_s3 + $0x1e0] sm:$0xff]  ;;  %v250_v42 = vld [vmem:[%s1054_s3 + $0x1f0] sm:$0xff] }
  0x1a   :  { %v639_v39 = vpack.c.bf16 %v251_v36, %v247_v34  ;;  %v609_v40 = vpack.c.bf16 %v248_v38, %v244_v37  ;;  %v641_v43 = vpack.c.bf16 %v250_v42, %v246_v41  ;;  %v536_v45 = vld [vmem:[%s1055_s2] ss:$0 sm:$0xff] }
  0x1b   :  { %630 = vmatpush1.bf16.msra.mxu0 %v629_v14  ;;  %v254_v14 = vlaneseq }
  0x1c   :  { %632 = vmatprep.subr.bf16.mxu0 %v631_v15  ;;  %602 = vmatpush1.bf16.msra.mxu1 %v601_v18  ;;  %v252_v18 = vld [vmem:[%s1056_s4] sm:$0xf] }
  0x1d   :  { %604 = vmatprep.subr.bf16.mxu1 %v603_v23  ;;  %v255_v15 = vshrl.u32 %v254_v14, 7 }
  0x1f   :  { %634 = vmatpush1.bf16.msra.mxu0 %v633_v19  ;;  %v256_v16 = vsub.s32 0, %v255_v15  ;;  %v264_v17 = vsub.s32 2, %v255_v15  ;;  %v260_v19 = vsub.s32 1, %v255_v15  ;;  %v268_v20 = vsub.s32 3, %v255_v15 }
  0x20   :  { %636 = vmatprep.subr.bf16.mxu0 %v635_v27  ;;  %606 = vmatpush1.bf16.msra.mxu1 %v605_v28 }
  0x21   :  { %608 = vmatprep.subr.bf16.mxu1 %v607_v35  ;;  %v916_v21 = vrot.slane %v252_v18, %v256_v16  ;;  %v918_v22 = vrot.slane %v252_v18, %v264_v17  ;;  %v920_v23 = vrot.slane %v252_v18, %v260_v19  ;;  %v922_v24 = vrot.slane %v252_v18, %v268_v20 }
  0x23   :  { %638 = vmatpush1.bf16.msra.mxu0 %v637_v31 }
  0x24   :  { %640 = vmatprep.subr.bf16.mxu0 %v639_v39  ;;  %610 = vmatpush1.bf16.msra.mxu1 %v609_v40 }
  0x27   :  { %642 = vmatpush1.bf16.msra.mxu0 %v641_v43 }
  0xdd   :  { %v565_v46 = vpop.f32.mrb[0].mxu0 }
  0xde   :  { %v133_v47 = vpop.f32.mrb[1].mxu0  ;;  %v139_v48 = vadd.f32 %v565_v46, %v536_v45 }
  0xdf   :  { %v134_v49 = vadd.f32 %v536_v45, %v133_v47 }
  0xe0   :  { %v173_v53 = vmul.f32 0.1, %v139_v48 }
  0xe1   :  { %v172_v50 = vmul.f32 0.1, %v134_v49  ;;  %v568_v51 = vpop.f32.mrb[2].mxu0 }
  0xe2   :  { %v143_v52 = vpop.f32.mrb[3].mxu0  ;;  %v181_v58 = vmax.f32 %v139_v48, %v173_v53  ;;  %v149_v59 = vadd.f32 %v568_v51, %v536_v45 }
  0xe3   :  { %v180_v54 = vmax.f32 %v134_v49, %v172_v50  ;;  %v144_v55 = vadd.f32 %v536_v45, %v143_v52 }
  0xe4   :  { %v175_v63 = vmul.f32 0.1, %v149_v59 }
  0xe5   :  { %339 = vmatmul.mubr.f32.vlgmr.msra.gmra.mrb[0].mxu1 %v180_v54  ;;  %452 = vmatmul.mubr.f32.vlgmr.msra.gmra.mrb[8].mxu0 %v180_v54  ;;  %v571_v56 = vpop.f32.mrb[4].mxu0  ;;  %v174_v60 = vmul.f32 0.1, %v144_v55 }
  0xe6   :  { %344 = vmatprep.mubr.f32.mxu1 %v644_v44  ;;  %457 = vmatprep.mubr.f32.mxu0 %v644_v44  ;;  %v153_v57 = vpop.f32.mrb[5].mxu0  ;;  %v183_v2 = vmax.f32 %v149_v59, %v175_v63  ;;  %v159_v3 = vadd.f32 %v571_v56, %v536_v45 }
  0xe7   :  { %v182_v0 = vmax.f32 %v144_v55, %v174_v60  ;;  %v154_v1 = vadd.f32 %v536_v45, %v153_v57 }
  0xe8   :  { %v177_v5 = vmul.f32 0.1, %v159_v3 }
  0xe9   :  { %345 = vmatmul.mubr.f32.gmra.mrb[2].mxu1 %v181_v58  ;;  %458 = vmatmul.mubr.f32.gmra.mrb[10].mxu0 %v181_v58  ;;  %v574_v61 = vpop.f32.mrb[6].mxu0  ;;  %v176_v4 = vmul.f32 0.1, %v154_v1 }
  0xea   :  { %350 = vmatprep.mubr.f32.mxu1 %v644_v44  ;;  %463 = vmatprep.mubr.f32.mxu0 %v644_v44  ;;  %v163_v62 = vpop.f32.mrb[7].mxu0  ;;  %v185_v8 = vmax.f32 %v159_v3, %v177_v5  ;;  %v169_v9 = vadd.f32 %v574_v61, %v536_v45 }
  0xeb   :  { %v184_v6 = vmax.f32 %v154_v1, %v176_v4  ;;  %v164_v7 = vadd.f32 %v536_v45, %v163_v62 }
  0xec   :  { %v179_v11 = vmul.f32 0.1, %v169_v9 }
  0xed   :  { %351 = vmatmul.mubr.f32.gmra.mrb[4].mxu1 %v182_v0  ;;  %464 = vmatmul.mubr.f32.gmra.mrb[12].mxu0 %v182_v0  ;;  %v178_v10 = vmul.f32 0.1, %v164_v7 }
  0xee   :  { %356 = vmatprep.mubr.f32.mxu1 %v644_v44  ;;  %469 = vmatprep.mubr.f32.mxu0 %v644_v44  ;;  %v187_v13 = vmax.f32 %v169_v9, %v179_v11 }
  0xef   :  { %v186_v12 = vmax.f32 %v164_v7, %v178_v10 }
  0xf1   :  { %357 = vmatmul.mubr.f32.gmra.mrb[6].mxu1 %v183_v2  ;;  %470 = vmatmul.mubr.f32.gmra.mrb[14].mxu0 %v183_v2 }
  0xf2   :  { %362 = vmatprep.mubr.f32.mxu1 %v644_v44  ;;  %475 = vmatprep.mubr.f32.mxu0 %v644_v44 }
  0xf5   :  { %363 = vmatmul.mubr.f32.gmra.mrb[8].mxu1 %v184_v6  ;;  %476 = vmatmul.mubr.f32.gmra.mrb[16].mxu0 %v184_v6 }
  0xf6   :  { %368 = vmatprep.mubr.f32.mxu1 %v644_v44  ;;  %481 = vmatprep.mubr.f32.mxu0 %v644_v44 }
  0xf9   :  { %369 = vmatmul.mubr.f32.gmra.mrb[10].mxu1 %v185_v8  ;;  %482 = vmatmul.mubr.f32.gmra.mrb[18].mxu0 %v185_v8 }
  0xfa   :  { %374 = vmatprep.mubr.f32.mxu1 %v644_v44  ;;  %487 = vmatprep.mubr.f32.mxu0 %v644_v44 }
  0xfd   :  { %375 = vmatmul.mubr.f32.gmra.mrb[12].mxu1 %v186_v12  ;;  %488 = vmatmul.mubr.f32.gmra.mrb[20].mxu0 %v186_v12 }
  0xfe   :  { %380 = vmatprep.mubr.f32.mxu1 %v644_v44  ;;  %493 = vmatprep.mubr.f32.mxu0 %v644_v44 }
 0x101   :  { %381 = vmatmul.mubr.f32.gmra.mrb[14].mxu1 %v187_v13  ;;  %494 = vmatmul.mubr.f32.gmra.mrb[22].mxu0 %v187_v13 }
 0x1b8   :  { %v340_v25 = vpop.f32.mrb[0].mxu1  ;;  %v453_v26 = vpop.f32.mrb[8].mxu0 }
 0x1b9   :  { %v341_v27 = vadd.f32 %v340_v25, %v916_v21  ;;  %v454_v28 = vadd.f32 %v453_v26, %v918_v22  ;;  %v342_v29 = vpop.f32.mrb[1].mxu1  ;;  %v455_v30 = vpop.f32.mrb[9].mxu0 }
 0x1ba   :  { %v343_v31 = vadd.f32 %v342_v29, %v920_v23  ;;  %v456_v32 = vadd.f32 %v455_v30, %v922_v24 }
 0x1bb   :  { %500 = vst [vmem:[%s1057_s5] sm:$0xff] %v341_v27  ;;  %502 = vst [vmem:[%s1057_s5 + $0x10] sm:$0xff] %v454_v28 }
 0x1bc   :  { %501 = vst [vmem:[%s1057_s5 + $0x8] sm:$0xff] %v343_v31  ;;  %503 = vst [vmem:[%s1057_s5 + $0x18] sm:$0xff] %v456_v32  ;;  %v346_v33 = vpop.f32.mrb[2].mxu1  ;;  %v459_v34 = vpop.f32.mrb[10].mxu0 }
 0x1bd   :  { %v347_v35 = vadd.f32 %v346_v33, %v916_v21  ;;  %v460_v36 = vadd.f32 %v459_v34, %v918_v22  ;;  %v348_v37 = vpop.f32.mrb[3].mxu1  ;;  %v461_v38 = vpop.f32.mrb[11].mxu0 }
 0x1be   :  { %v349_v39 = vadd.f32 %v348_v37, %v920_v23  ;;  %v462_v40 = vadd.f32 %v461_v38, %v922_v24 }
 0x1bf   :  { %504 = vst [vmem:[%s1057_s5 + $0x20] sm:$0xff] %v347_v35  ;;  %506 = vst [vmem:[%s1057_s5 + $0x30] sm:$0xff] %v460_v36 }
 0x1c0   :  { %505 = vst [vmem:[%s1057_s5 + $0x28] sm:$0xff] %v349_v39  ;;  %507 = vst [vmem:[%s1057_s5 + $0x38] sm:$0xff] %v462_v40  ;;  %v352_v41 = vpop.f32.mrb[4].mxu1  ;;  %v465_v42 = vpop.f32.mrb[12].mxu0 }
 0x1c1   :  { %v353_v43 = vadd.f32 %v352_v41, %v916_v21  ;;  %v466_v44 = vadd.f32 %v465_v42, %v918_v22  ;;  %v354_v45 = vpop.f32.mrb[5].mxu1  ;;  %v467_v46 = vpop.f32.mrb[13].mxu0 }
 0x1c2   :  { %v355_v47 = vadd.f32 %v354_v45, %v920_v23  ;;  %v468_v48 = vadd.f32 %v467_v46, %v922_v24 }
 0x1c3   :  { %508 = vst [vmem:[%s1057_s5 + $0x40] sm:$0xff] %v353_v43  ;;  %510 = vst [vmem:[%s1057_s5 + $0x50] sm:$0xff] %v466_v44 }
 0x1c4   :  { %509 = vst [vmem:[%s1057_s5 + $0x48] sm:$0xff] %v355_v47  ;;  %511 = vst [vmem:[%s1057_s5 + $0x58] sm:$0xff] %v468_v48  ;;  %v358_v49 = vpop.f32.mrb[6].mxu1  ;;  %v471_v50 = vpop.f32.mrb[14].mxu0 }
 0x1c5   :  { %v359_v51 = vadd.f32 %v358_v49, %v916_v21  ;;  %v472_v52 = vadd.f32 %v471_v50, %v918_v22  ;;  %v360_v53 = vpop.f32.mrb[7].mxu1  ;;  %v473_v54 = vpop.f32.mrb[15].mxu0 }
 0x1c6   :  { %v361_v55 = vadd.f32 %v360_v53, %v920_v23  ;;  %v474_v56 = vadd.f32 %v473_v54, %v922_v24 }
 0x1c7   :  { %512 = vst [vmem:[%s1057_s5 + $0x60] sm:$0xff] %v359_v51  ;;  %514 = vst [vmem:[%s1057_s5 + $0x70] sm:$0xff] %v472_v52 }
 0x1c8   :  { %513 = vst [vmem:[%s1057_s5 + $0x68] sm:$0xff] %v361_v55  ;;  %515 = vst [vmem:[%s1057_s5 + $0x78] sm:$0xff] %v474_v56  ;;  %v364_v57 = vpop.f32.mrb[8].mxu1  ;;  %v477_v58 = vpop.f32.mrb[16].mxu0 }
 0x1c9   :  { %v365_v59 = vadd.f32 %v364_v57, %v916_v21  ;;  %v478_v60 = vadd.f32 %v477_v58, %v918_v22  ;;  %v366_v61 = vpop.f32.mrb[9].mxu1  ;;  %v479_v62 = vpop.f32.mrb[17].mxu0 }
 0x1ca   :  { %v367_v63 = vadd.f32 %v366_v61, %v920_v23  ;;  %v480_v0 = vadd.f32 %v479_v62, %v922_v24 }
 0x1cb   :  { %516 = vst [vmem:[%s1057_s5 + $0x80] sm:$0xff] %v365_v59  ;;  %518 = vst [vmem:[%s1057_s5 + $0x90] sm:$0xff] %v478_v60 }
 0x1cc   :  { %517 = vst [vmem:[%s1057_s5 + $0x88] sm:$0xff] %v367_v63  ;;  %519 = vst [vmem:[%s1057_s5 + $0x98] sm:$0xff] %v480_v0  ;;  %v370_v1 = vpop.f32.mrb[10].mxu1  ;;  %v483_v2 = vpop.f32.mrb[18].mxu0 }
 0x1cd   :  { %v371_v3 = vadd.f32 %v370_v1, %v916_v21  ;;  %v484_v4 = vadd.f32 %v483_v2, %v918_v22  ;;  %v372_v5 = vpop.f32.mrb[11].mxu1  ;;  %v485_v6 = vpop.f32.mrb[19].mxu0 }
 0x1ce   :  { %v373_v7 = vadd.f32 %v372_v5, %v920_v23  ;;  %v486_v8 = vadd.f32 %v485_v6, %v922_v24 }
 0x1cf   :  { %520 = vst [vmem:[%s1057_s5 + $0xa0] sm:$0xff] %v371_v3  ;;  %522 = vst [vmem:[%s1057_s5 + $0xb0] sm:$0xff] %v484_v4 }
 0x1d0   :  { %521 = vst [vmem:[%s1057_s5 + $0xa8] sm:$0xff] %v373_v7  ;;  %523 = vst [vmem:[%s1057_s5 + $0xb8] sm:$0xff] %v486_v8  ;;  %v376_v9 = vpop.f32.mrb[12].mxu1  ;;  %v489_v10 = vpop.f32.mrb[20].mxu0 }
 0x1d1   :  { %v377_v11 = vadd.f32 %v376_v9, %v916_v21  ;;  %v490_v12 = vadd.f32 %v489_v10, %v918_v22  ;;  %v378_v13 = vpop.f32.mrb[13].mxu1  ;;  %v491_v14 = vpop.f32.mrb[21].mxu0 }
 0x1d2   :  { %v379_v15 = vadd.f32 %v378_v13, %v920_v23  ;;  %v492_v16 = vadd.f32 %v491_v14, %v922_v24 }
 0x1d3   :  { %524 = vst [vmem:[%s1057_s5 + $0xc0] sm:$0xff] %v377_v11  ;;  %526 = vst [vmem:[%s1057_s5 + $0xd0] sm:$0xff] %v490_v12 }
 0x1d4   :  { %525 = vst [vmem:[%s1057_s5 + $0xc8] sm:$0xff] %v379_v15  ;;  %527 = vst [vmem:[%s1057_s5 + $0xd8] sm:$0xff] %v492_v16  ;;  %v382_v17 = vpop.f32.mrb[14].mxu1  ;;  %v495_v18 = vpop.f32.mrb[22].mxu0 }
 0x1d5   :  { %v383_v19 = vadd.f32 %v382_v17, %v916_v21  ;;  %v496_v20 = vadd.f32 %v495_v18, %v918_v22  ;;  %v384_v25 = vpop.f32.mrb[15].mxu1  ;;  %v497_v26 = vpop.f32.mrb[23].mxu0 }
 0x1d6   :  { %v385_v27 = vadd.f32 %v384_v25, %v920_v23  ;;  %v498_v28 = vadd.f32 %v497_v26, %v922_v24 }
 0x1d7   :  { %528 = vst [vmem:[%s1057_s5 + $0xe0] sm:$0xff] %v383_v19  ;;  %530 = vst [vmem:[%s1057_s5 + $0xf0] sm:$0xff] %v496_v20 }
 0x1d8   :  { %529 = vst [vmem:[%s1057_s5 + $0xe8] sm:$0xff] %v385_v27  ;;  %531 = vst [vmem:[%s1057_s5 + $0xf8] sm:$0xff] %v498_v28 }

// kernel: crnn_forward.3
= control target key start
LH: loop header
LB: loop body
LE: loop exit
PB: predicated region body
PF: predicated region fallthrough
CT: control target
= control target key end

     0   :  { %v2363_v3 = vmov 0.0   ;;  %vm2365_vm0 = vmmov 0   ;;  %s3100_s1 = inlined_call_operand.vmem [shape: f32[128,512], index: 1, kind: input, shape index: {}]   ;;  %s3101_s0 = inlined_call_operand.vmem [shape: f32[8,8,512], index: 0, kind: input, shape index: {}]   ;;  %s3102_s2 = inlined_call_operand.vmem [shape: f32[128,128], index: 2, kind: input, shape index: {}]   ;;  %s3103_s3 = inlined_call_operand.vmem [shape: f32[1,128], index: 3, kind: input, shape index: {}]   ;;  %s3104_s4 = inlined_call_operand.vmem [shape: f32[8,128], index: 4, kind: output, shape index: {}]  }
   0x1   :  { %v30_v0 = vld [vmem:[%s3100_s1 + $0x8] sm:$0xff]  ;;  %v29_v2 = vld [vmem:[%s3100_s1] sm:$0xff]  ;;  %157 = vmatprep.mubr.f32.mxu0 %v2363_v3  ;;  %228 = vmatprep.mubr.f32.mxu1 %v2363_v3  ;;  %v32_v19 = vld [vmem:[%s3100_s1 + $0x18] sm:$0xff] }
   0x2   :  { %v34_v1 = vld [vmem:[%s3100_s1 + $0x28] sm:$0xff]  ;;  %v33_v5 = vld [vmem:[%s3100_s1 + $0x20] sm:$0xff]  ;;  %v36_v20 = vld [vmem:[%s3100_s1 + $0x38] sm:$0xff] }
   0x3   :  { %v2402_v4 = vpack.c.bf16 %v34_v1, %v30_v0  ;;  %v38_v6 = vld [vmem:[%s3100_s1 + $0x48] sm:$0xff]  ;;  %v2413_v8 = vpack.c.bf16 %v33_v5, %v29_v2  ;;  %v37_v10 = vld [vmem:[%s3100_s1 + $0x40] sm:$0xff]  ;;  %v2454_v22 = vpack.c.bf16 %v36_v20, %v32_v19  ;;  %v31_v23 = vld [vmem:[%s3100_s1 + $0x10] sm:$0xff] }
   0x4   :  { %v42_v7 = vld [vmem:[%s3100_s1 + $0x68] sm:$0xff]  ;;  %v41_v11 = vld [vmem:[%s3100_s1 + $0x60] sm:$0xff]  ;;  %v35_v24 = vld [vmem:[%s3100_s1 + $0x30] sm:$0xff] }
   0x5   :  { %v2415_v9 = vpack.c.bf16 %v42_v7, %v38_v6  ;;  %v46_v12 = vld [vmem:[%s3100_s1 + $0x88] sm:$0xff]  ;;  %1697 = vmatprep.subr.bf16.mxu0 %v2402_v4  ;;  %v2431_v14 = vpack.c.bf16 %v41_v11, %v37_v10  ;;  %v45_v15 = vld [vmem:[%s3100_s1 + $0x80] sm:$0xff]  ;;  %v2462_v25 = vpack.c.bf16 %v35_v24, %v31_v23  ;;  %1729 = vmatprep.subr.bf16.mxu1 %v2454_v22  ;;  %v40_v27 = vld [vmem:[%s3100_s1 + $0x58] sm:$0xff] }
   0x6   :  { %v50_v13 = vld [vmem:[%s3100_s1 + $0xa8] sm:$0xff]  ;;  %1699 = vmatpush1.bf16.msra.mxu0 %v2413_v8  ;;  %v49_v16 = vld [vmem:[%s3100_s1 + $0xa0] sm:$0xff]  ;;  %v44_v28 = vld [vmem:[%s3100_s1 + $0x78] sm:$0xff] }
   0x7   :  { %1701 = vmatprep.subr.bf16.mxu0 %v2415_v9  ;;  %v2440_v17 = vpack.c.bf16 %v50_v13, %v46_v12  ;;  %v54_v18 = vld [vmem:[%s3100_s1 + $0xc8] sm:$0xff]  ;;  %v2465_v26 = vpack.c.bf16 %v49_v16, %v45_v15  ;;  %v39_v29 = vld [vmem:[%s3100_s1 + $0x50] sm:$0xff]  ;;  %v53_v31 = vld [vmem:[%s3100_s1 + $0xc0] sm:$0xff]  ;;  %1731 = vmatpush1.bf16.msra.mxu1 %v2462_v25  ;;  %v2487_v33 = vpack.c.bf16 %v44_v28, %v40_v27 }
   0x8   :  { %v58_v21 = vld [vmem:[%s3100_s1 + $0xe8] sm:$0xff]  ;;  %v57_v32 = vld [vmem:[%s3100_s1 + $0xe0] sm:$0xff]  ;;  %v43_v34 = vld [vmem:[%s3100_s1 + $0x70] sm:$0xff] }
   0x9   :  { %v2478_v30 = vpack.c.bf16 %v58_v21, %v54_v18  ;;  %v62_v35 = vld [vmem:[%s3100_s1 + $0x108] sm:$0xff]  ;;  %v2498_v37 = vpack.c.bf16 %v43_v34, %v39_v29  ;;  %v48_v38 = vld [vmem:[%s3100_s1 + $0x98] sm:$0xff]  ;;  %1733 = vmatprep.subr.bf16.mxu1 %v2487_v33  ;;  %v47_v40 = vld [vmem:[%s3100_s1 + $0x90] sm:$0xff]  ;;  %v2514_v42 = vpack.c.bf16 %v57_v32, %v53_v31 }
   0xa   :  { %1703 = vmatpush1.bf16.msra.mxu0 %v2431_v14  ;;  %v66_v36 = vld [vmem:[%s3100_s1 + $0x128] sm:$0xff]  ;;  %v52_v39 = vld [vmem:[%s3100_s1 + $0xb8] sm:$0xff]  ;;  %v51_v41 = vld [vmem:[%s3100_s1 + $0xb0] sm:$0xff] }
   0xb   :  { %1705 = vmatprep.subr.bf16.mxu0 %v2440_v17  ;;  %v61_v43 = vld [vmem:[%s3100_s1 + $0x100] sm:$0xff]  ;;  %v2522_v45 = vpack.c.bf16 %v52_v39, %v48_v38  ;;  %v2525_v46 = vpack.c.bf16 %v66_v36, %v62_v35  ;;  %1735 = vmatpush1.bf16.msra.mxu1 %v2498_v37  ;;  %v70_v47 = vld [vmem:[%s3100_s1 + $0x148] sm:$0xff]  ;;  %v2531_v48 = vpack.c.bf16 %v51_v41, %v47_v40  ;;  %v56_v49 = vld [vmem:[%s3100_s1 + $0xd8] sm:$0xff] }
   0xc   :  { %v65_v44 = vld [vmem:[%s3100_s1 + $0x120] sm:$0xff]  ;;  %v60_v50 = vld [vmem:[%s3100_s1 + $0xf8] sm:$0xff]  ;;  %v74_v51 = vld [vmem:[%s3100_s1 + $0x168] sm:$0xff] }
   0xd   :  { %1737 = vmatprep.subr.bf16.mxu1 %v2522_v45  ;;  %v2543_v52 = vpack.c.bf16 %v60_v50, %v56_v49  ;;  %v55_v53 = vld [vmem:[%s3100_s1 + $0xd0] sm:$0xff]  ;;  %v2552_v55 = vpack.c.bf16 %v65_v44, %v61_v43  ;;  %v64_v56 = vld [vmem:[%s3100_s1 + $0x118] sm:$0xff]  ;;  %v2561_v58 = vpack.c.bf16 %v74_v51, %v70_v47  ;;  %v69_v59 = vld [vmem:[%s3100_s1 + $0x140] sm:$0xff] }
   0xe   :  { %1707 = vmatpush1.bf16.msra.mxu0 %v2465_v26  ;;  %v59_v54 = vld [vmem:[%s3100_s1 + $0xf0] sm:$0xff]  ;;  %v68_v57 = vld [vmem:[%s3100_s1 + $0x138] sm:$0xff]  ;;  %v73_v60 = vld [vmem:[%s3100_s1 + $0x160] sm:$0xff] }
   0xf   :  { %1709 = vmatprep.subr.bf16.mxu0 %v2478_v30  ;;  %1739 = vmatpush1.bf16.msra.mxu1 %v2531_v48  ;;  %v78_v61 = vld [vmem:[%s3100_s1 + $0x188] sm:$0xff]  ;;  %v2573_v62 = vpack.c.bf16 %v59_v54, %v55_v53  ;;  %v2579_v0 = vpack.c.bf16 %v68_v57, %v64_v56  ;;  %v63_v1 = vld [vmem:[%s3100_s1 + $0x110] sm:$0xff]  ;;  %v72_v5 = vld [vmem:[%s3100_s1 + $0x158] sm:$0xff]  ;;  %v2594_v7 = vpack.c.bf16 %v73_v60, %v69_v59 }
  0x10   :  { %v82_v63 = vld [vmem:[%s3100_s1 + $0x1a8] sm:$0xff]  ;;  %1741 = vmatprep.subr.bf16.mxu1 %v2543_v52  ;;  %v67_v2 = vld [vmem:[%s3100_s1 + $0x130] sm:$0xff]  ;;  %v76_v6 = vld [vmem:[%s3100_s1 + $0x178] sm:$0xff] }
  0x11   :  { %v2597_v10 = vpack.c.bf16 %v82_v63, %v78_v61  ;;  %v77_v11 = vld [vmem:[%s3100_s1 + $0x180] sm:$0xff]  ;;  %v86_v13 = vld [vmem:[%s3100_s1 + $0x1c8] sm:$0xff]  ;;  %v2609_v15 = vpack.c.bf16 %v67_v2, %v63_v1  ;;  %v2615_v18 = vpack.c.bf16 %v76_v6, %v72_v5  ;;  %v71_v19 = vld [vmem:[%s3100_s1 + $0x150] sm:$0xff] }
  0x12   :  { %1711 = vmatpush1.bf16.msra.mxu0 %v2514_v42  ;;  %v81_v12 = vld [vmem:[%s3100_s1 + $0x1a0] sm:$0xff]  ;;  %v90_v16 = vld [vmem:[%s3100_s1 + $0x1e8] sm:$0xff]  ;;  %v75_v20 = vld [vmem:[%s3100_s1 + $0x170] sm:$0xff] }
  0x13   :  { %1713 = vmatprep.subr.bf16.mxu0 %v2525_v46  ;;  %1743 = vmatpush1.bf16.msra.mxu1 %v2573_v62  ;;  %v80_v21 = vld [vmem:[%s3100_s1 + $0x198] sm:$0xff]  ;;  %v2630_v24 = vpack.c.bf16 %v81_v12, %v77_v11  ;;  %v2633_v27 = vpack.c.bf16 %v90_v16, %v86_v13  ;;  %v85_v28 = vld [vmem:[%s3100_s1 + $0x1c0] sm:$0xff]  ;;  %v2642_v31 = vpack.c.bf16 %v75_v20, %v71_v19  ;;  %v79_v34 = vld [vmem:[%s3100_s1 + $0x190] sm:$0xff] }
  0x14   :  { %1745 = vmatprep.subr.bf16.mxu1 %v2579_v0  ;;  %v84_v23 = vld [vmem:[%s3100_s1 + $0x1b8] sm:$0xff]  ;;  %v89_v29 = vld [vmem:[%s3100_s1 + $0x1e0] sm:$0xff]  ;;  %v83_v35 = vld [vmem:[%s3100_s1 + $0x1b0] sm:$0xff] }
  0x15   :  { %v2645_v32 = vpack.c.bf16 %v84_v23, %v80_v21  ;;  %v88_v36 = vld [vmem:[%s3100_s1 + $0x1d8] sm:$0xff]  ;;  %v2660_v39 = vpack.c.bf16 %v89_v29, %v85_v28  ;;  %v2664_v40 = vpack.c.bf16 %v83_v35, %v79_v34  ;;  %v87_v43 = vld [vmem:[%s3100_s1 + $0x1d0] sm:$0xff]  ;;  %v25_v49 = vld [vmem:[%s3101_s0] sm:$0xff] }
  0x16   :  { %1715 = vmatpush1.bf16.msra.mxu0 %v2552_v55  ;;  %v92_v38 = vld [vmem:[%s3100_s1 + $0x1f8] sm:$0xff]  ;;  %v91_v44 = vld [vmem:[%s3100_s1 + $0x1f0] sm:$0xff]  ;;  %v26_v50 = vld [vmem:[%s3101_s0 + $0x8] sm:$0xff] }
  0x17   :  { %1717 = vmatprep.subr.bf16.mxu0 %v2561_v58  ;;  %1747 = vmatpush1.bf16.msra.mxu1 %v2609_v15  ;;  %v2667_v41 = vpack.c.bf16 %v92_v38, %v88_v36  ;;  %v2677_v47 = vpack.c.bf16 %v91_v44, %v87_v43  ;;  %v28_v60 = vld [vmem:[%s3101_s0 + $0x18] sm:$0xff]  ;;  %v27_v2 = vld [vmem:[%s3101_s0 + $0x10] sm:$0xff]  ;;  %v1594_v44 = vld [vmem:[%s3101_s0 + $0x20] sm:$0xff] }
  0x18   :  { %1749 = vmatprep.subr.bf16.mxu1 %v2615_v18 }
  0x1a   :  { %1719 = vmatpush1.bf16.msra.mxu0 %v2594_v7 }
  0x1b   :  { %1721 = vmatprep.subr.bf16.mxu0 %v2597_v10  ;;  %1751 = vmatpush1.bf16.msra.mxu1 %v2642_v31 }
  0x1c   :  { %1753 = vmatprep.subr.bf16.mxu1 %v2645_v32 }
  0x1e   :  { %1723 = vmatpush1.bf16.msra.mxu0 %v2630_v24 }
  0x1f   :  { %1725 = vmatprep.subr.bf16.mxu0 %v2633_v27  ;;  %1755 = vmatpush1.bf16.msra.mxu1 %v2664_v40 }
  0x20   :  { %1757 = vmatprep.subr.bf16.mxu1 %v2667_v41 }
  0x22   :  { %1727 = vmatpush1.bf16.msra.mxu0 %v2660_v39 }
  0x23   :  { %1761 = vmatprep.subr.bf16.mxu0 %v2402_v4  ;;  %1759 = vmatpush1.bf16.msra.mxu1 %v2677_v47 }
  0x24   :  { %1793 = vmatprep.subr.bf16.mxu1 %v2454_v22 }
  0x25   :  { %158 = vmatmul.mubr.f32.vlgmr.msra.gmra.mrb[0].mxu0 %v2363_v3 }
  0x26   :  { %1763 = vmatpush1.bf16.msra.mxu0 %v2413_v8  ;;  %332 = vmatprep.mubr.f32.mxu0 %v2363_v3 }
  0x27   :  { %1765 = vmatprep.subr.bf16.mxu0 %v2415_v9  ;;  %229 = vmatmul.mubr.f32.vlgmr.msra.gmra.mrb[0].mxu1 %v2363_v3 }
  0x28   :  { %1795 = vmatpush1.bf16.msra.mxu1 %v2462_v25  ;;  %403 = vmatprep.mubr.f32.mxu1 %v2363_v3 }
  0x29   :  { %1797 = vmatprep.subr.bf16.mxu1 %v2487_v33 }
  0x2a   :  { %1767 = vmatpush1.bf16.msra.mxu0 %v2431_v14 }
  0x2b   :  { %1769 = vmatprep.subr.bf16.mxu0 %v2440_v17 }
  0x2c   :  { %1799 = vmatpush1.bf16.msra.mxu1 %v2498_v37 }
  0x2d   :  { %1801 = vmatprep.subr.bf16.mxu1 %v2522_v45 }
  0x2e   :  { %1771 = vmatpush1.bf16.msra.mxu0 %v2465_v26 }
  0x2f   :  { %1773 = vmatprep.subr.bf16.mxu0 %v2478_v30 }
  0x30   :  { %1803 = vmatpush1.bf16.msra.mxu1 %v2531_v48 }
  0x31   :  { %1805 = vmatprep.subr.bf16.mxu1 %v2543_v52 }
  0x32   :  { %1775 = vmatpush1.bf16.msra.mxu0 %v2514_v42 }
  0x33   :  { %1777 = vmatprep.subr.bf16.mxu0 %v2525_v46 }
  0x34   :  { %1807 = vmatpush1.bf16.msra.mxu1 %v2573_v62 }
  0x35   :  { %1809 = vmatprep.subr.bf16.mxu1 %v2579_v0 }
  0x36   :  { %1779 = vmatpush1.bf16.msra.mxu0 %v2552_v55 }
  0x37   :  { %1781 = vmatprep.subr.bf16.mxu0 %v2561_v58 }
  0x38   :  { %1811 = vmatpush1.bf16.msra.mxu1 %v2609_v15 }
  0x39   :  { %1813 = vmatprep.subr.bf16.mxu1 %v2615_v18 }
  0x3a   :  { %1783 = vmatpush1.bf16.msra.mxu0 %v2594_v7 }
  0x3b   :  { %1785 = vmatprep.subr.bf16.mxu0 %v2597_v10 }
  0x3c   :  { %1815 = vmatpush1.bf16.msra.mxu1 %v2642_v31 }
  0x3d   :  { %1817 = vmatprep.subr.bf16.mxu1 %v2645_v32 }
  0x3e   :  { %1787 = vmatpush1.bf16.msra.mxu0 %v2630_v24 }
  0x3f   :  { %1789 = vmatprep.subr.bf16.mxu0 %v2633_v27 }
  0x40   :  { %1819 = vmatpush1.bf16.msra.mxu1 %v2664_v40 }
  0x41   :  { %1821 = vmatprep.subr.bf16.mxu1 %v2667_v41 }
  0x42   :  { %1791 = vmatpush1.bf16.msra.mxu0 %v2660_v39 }
  0x43   :  { %1825 = vmatprep.subr.bf16.mxu0 %v2402_v4 }
  0x44   :  { %1823 = vmatpush1.bf16.msra.mxu1 %v2677_v47 }
  0x45   :  { %1857 = vmatprep.subr.bf16.mxu1 %v2454_v22 }
  0xf8   :  { %v159_v51 = vpop.f32.mrb[0].mxu0 }
  0xf9   :  { %v235_v53 = vadd.f32 %v159_v51, %v25_v49  ;;  %v161_v54 = vpop.f32.mrb[1].mxu0  ;;  %v1595_v49 = vld [vmem:[%s3101_s0 + $0x28] sm:$0xff] }
  0xfa   :  { %v236_v56 = vadd.f32 %v161_v54, %v26_v50  ;;  %v230_v61 = vpop.f32.mrb[0].mxu1 }
  0xfb   :  { %v1591_v57 = vmul.f32 -1.442695, %v235_v53  ;;  %v232_v63 = vpop.f32.mrb[1].mxu1  ;;  %v237_v6 = vadd.f32 %v230_v61, %v27_v2  ;;  %v1597_v61 = vld [vmem:[%s3101_s0 + $0x38] sm:$0xff] }
  0xfc   :  { %v1592_v59 = vmul.f32 -1.442695, %v236_v56  ;;  %v238_v1 = vadd.f32 %v232_v63, %v28_v60 }
  0xfd   :  { %2235 = vpow2.f32 %v1591_v57 }
  0xfe   :  { %2237 = vpow2.f32 %v1592_v59  ;;  %v1593_v5 = vmul.f32 -1.442695, %v238_v1  ;;  %v1596_v1 = vld [vmem:[%s3101_s0 + $0x30] sm:$0xff] }
 0x100   :  { %2239 = vpow2.f32 %v1593_v5 }
 0x101   :  { %2241 = vtanh.f32 %v237_v6 }
 0x107   :  { %v2236_v11 = vpop.eup %2235 }
 0x108   :  { %v2238_v12 = vpop.eup %2237  ;;  %v242_v13 = vadd.f32 1.0, %v2236_v11 }
 0x109   :  { %v248_v16 = vadd.f32 1.0, %v2238_v12 }
 0x10a   :  { %2243 = vrcp.f32 %v242_v13  ;;  %v2240_v19 = vpop.eup %2239 }
 0x10b   :  { %2245 = vrcp.f32 %v248_v16  ;;  %v2242_v20 = vpop.eup %2241  ;;  %v255_v23 = vadd.f32 1.0, %v2240_v19 }
 0x10d   :  { %2247 = vrcp.f32 %v255_v23 }
 0x114   :  { %v2244_v21 = vpop.eup %2243 }
 0x115   :  { %v2246_v28 = vpop.eup %2245  ;;  %v259_v29 = vmul.f32 %v2244_v21, %v2242_v20 }
 0x116   :  { %v258_v34 = vmul.f32 0.0, %v2246_v28 }
 0x117   :  { %v2248_v36 = vpop.eup %2247 }
 0x118   :  { %v2731_v35 = vadd.f32 %v259_v29, %v258_v34 }
 0x11a   :  { %2249 = vtanh.f32 %v2731_v35 }
 0x124   :  { %v2250_v38 = vpop.eup %2249 }
 0x125   :  { %v262_v43 = vmul.f32 %v2250_v38, %v2248_v36 }
 0x127   :  { %333 = vmatmul.mubr.f32.vlgmr.msra.gmra.mrb[2].mxu0 %v262_v43  ;;  %404 = vmatmul.mubr.f32.vlgmr.msra.gmra.mrb[2].mxu1 %v262_v43 }
 0x128   :  { %1827 = vmatpush1.bf16.msra.mxu0 %v2413_v8  ;;  %1859 = vmatpush1.bf16.msra.mxu1 %v2462_v25 }
 0x129   :  { %1829 = vmatprep.subr.bf16.mxu0 %v2415_v9  ;;  %1861 = vmatprep.subr.bf16.mxu1 %v2487_v33 }
 0x12a   :  { %507 = vmatprep.mubr.f32.mxu0 %v2363_v3  ;;  %578 = vmatprep.mubr.f32.mxu1 %v2363_v3 }
 0x12c   :  { %1831 = vmatpush1.bf16.msra.mxu0 %v2431_v14  ;;  %1863 = vmatpush1.bf16.msra.mxu1 %v2498_v37 }
 0x12d   :  { %1833 = vmatprep.subr.bf16.mxu0 %v2440_v17  ;;  %1865 = vmatprep.subr.bf16.mxu1 %v2522_v45 }
 0x130   :  { %1835 = vmatpush1.bf16.msra.mxu0 %v2465_v26  ;;  %1867 = vmatpush1.bf16.msra.mxu1 %v2531_v48 }
 0x131   :  { %1837 = vmatprep.subr.bf16.mxu0 %v2478_v30  ;;  %1869 = vmatprep.subr.bf16.mxu1 %v2543_v52 }
 0x134   :  { %1839 = vmatpush1.bf16.msra.mxu0 %v2514_v42  ;;  %1871 = vmatpush1.bf16.msra.mxu1 %v2573_v62 }
 0x135   :  { %1841 = vmatprep.subr.bf16.mxu0 %v2525_v46  ;;  %1873 = vmatprep.subr.bf16.mxu1 %v2579_v0 }
 0x138   :  { %1843 = vmatpush1.bf16.msra.mxu0 %v2552_v55  ;;  %1875 = vmatpush1.bf16.msra.mxu1 %v2609_v15 }
 0x139   :  { %1845 = vmatprep.subr.bf16.mxu0 %v2561_v58  ;;  %1877 = vmatprep.subr.bf16.mxu1 %v2615_v18 }
 0x13c   :  { %1847 = vmatpush1.bf16.msra.mxu0 %v2594_v7  ;;  %1879 = vmatpush1.bf16.msra.mxu1 %v2642_v31 }
 0x13d   :  { %1849 = vmatprep.subr.bf16.mxu0 %v2597_v10  ;;  %1881 = vmatprep.subr.bf16.mxu1 %v2645_v32 }
 0x140   :  { %1851 = vmatpush1.bf16.msra.mxu0 %v2630_v24  ;;  %1883 = vmatpush1.bf16.msra.mxu1 %v2664_v40 }
 0x141   :  { %1853 = vmatprep.subr.bf16.mxu0 %v2633_v27  ;;  %1885 = vmatprep.subr.bf16.mxu1 %v2667_v41 }
 0x144   :  { %1855 = vmatpush1.bf16.msra.mxu0 %v2660_v39  ;;  %1887 = vmatpush1.bf16.msra.mxu1 %v2677_v47 }
 0x145   :  { %1889 = vmatprep.subr.bf16.mxu0 %v2402_v4  ;;  %1921 = vmatprep.subr.bf16.mxu1 %v2454_v22 }
 0x1fa   :  { %v334_v50 = vpop.f32.mrb[2].mxu0  ;;  %v405_v51 = vpop.f32.mrb[2].mxu1 }
 0x1fb   :  { %v410_v53 = vadd.f32 %v1594_v44, %v334_v50  ;;  %v336_v54 = vpop.f32.mrb[3].mxu0  ;;  %v407_v56 = vpop.f32.mrb[3].mxu1  ;;  %v412_v5 = vadd.f32 %v1596_v1, %v405_v51  ;;  %v1602_v44 = vld [vmem:[%s3101_s0 + $0x48] sm:$0xff] }
 0x1fc   :  { %v411_v57 = vadd.f32 %v1595_v49, %v336_v54  ;;  %v413_v63 = vadd.f32 %v1597_v61, %v407_v56 }
 0x1fd   :  { %v1598_v59 = vmul.f32 -1.442695, %v410_v53 }
 0x1fe   :  { %v1599_v60 = vmul.f32 -1.442695, %v411_v57  ;;  %v1600_v2 = vmul.f32 -1.442695, %v413_v63  ;;  %v1603_v63 = vld [vmem:[%s3101_s0 + $0x50] sm:$0xff] }
 0x1ff   :  { %2251 = vpow2.f32 %v1598_v59 }
 0x200   :  { %2253 = vpow2.f32 %v1599_v60  ;;  %v1604_v60 = vld [vmem:[%s3101_s0 + $0x58] sm:$0xff] }
 0x201   :  { %2255 = vpow2.f32 %v1600_v2 }
 0x202   :  { %2257 = vtanh.f32 %v412_v5 }
 0x209   :  { %v2252_v6 = vpop.eup %2251 }
 0x20a   :  { %v2254_v11 = vpop.eup %2253  ;;  %v417_v12 = vadd.f32 1.0, %v2252_v6 }
 0x20b   :  { %v423_v13 = vadd.f32 1.0, %v2254_v11  ;;  %v2256_v16 = vpop.eup %2255 }
 0x20c   :  { %2259 = vrcp.f32 %v417_v12  ;;  %v2258_v19 = vpop.eup %2257  ;;  %v430_v28 = vadd.f32 1.0, %v2256_v16 }
 0x20d   :  { %2261 = vrcp.f32 %v423_v13 }
 0x20e   :  { %2263 = vrcp.f32 %v430_v28 }
 0x216   :  { %v2260_v20 = vpop.eup %2259 }
 0x217   :  { %v2262_v21 = vpop.eup %2261  ;;  %v434_v23 = vmul.f32 %v2260_v20, %v2258_v19 }
 0x218   :  { %v433_v29 = vmul.f32 %v2262_v21, %v2731_v35  ;;  %v2264_v36 = vpop.eup %2263  ;;  %v1601_v35 = vld [vmem:[%s3101_s0 + $0x40] sm:$0xff] }
 0x21a   :  { %v2781_v34 = vadd.f32 %v434_v23, %v433_v29 }
 0x21c   :  { %2265 = vtanh.f32 %v2781_v34 }
 0x226   :  { %v2266_v38 = vpop.eup %2265 }
 0x227   :  { %v437_v43 = vmul.f32 %v2266_v38, %v2264_v36 }
 0x229   :  { %508 = vmatmul.mubr.f32.vlgmr.msra.gmra.mrb[4].mxu0 %v437_v43  ;;  %579 = vmatmul.mubr.f32.vlgmr.msra.gmra.mrb[4].mxu1 %v437_v43 }
 0x22a   :  { %1891 = vmatpush1.bf16.msra.mxu0 %v2413_v8  ;;  %1923 = vmatpush1.bf16.msra.mxu1 %v2462_v25 }
 0x22b   :  { %1893 = vmatprep.subr.bf16.mxu0 %v2415_v9  ;;  %1925 = vmatprep.subr.bf16.mxu1 %v2487_v33 }
 0x22c   :  { %682 = vmatprep.mubr.f32.mxu0 %v2363_v3  ;;  %753 = vmatprep.mubr.f32.mxu1 %v2363_v3 }
 0x22e   :  { %1895 = vmatpush1.bf16.msra.mxu0 %v2431_v14  ;;  %1927 = vmatpush1.bf16.msra.mxu1 %v2498_v37 }
 0x22f   :  { %1897 = vmatprep.subr.bf16.mxu0 %v2440_v17  ;;  %1929 = vmatprep.subr.bf16.mxu1 %v2522_v45 }
 0x232   :  { %1899 = vmatpush1.bf16.msra.mxu0 %v2465_v26  ;;  %1931 = vmatpush1.bf16.msra.mxu1 %v2531_v48 }
 0x233   :  { %1901 = vmatprep.subr.bf16.mxu0 %v2478_v30  ;;  %1933 = vmatprep.subr.bf16.mxu1 %v2543_v52 }
 0x236   :  { %1903 = vmatpush1.bf16.msra.mxu0 %v2514_v42  ;;  %1935 = vmatpush1.bf16.msra.mxu1 %v2573_v62 }
 0x237   :  { %1905 = vmatprep.subr.bf16.mxu0 %v2525_v46  ;;  %1937 = vmatprep.subr.bf16.mxu1 %v2579_v0 }
 0x23a   :  { %1907 = vmatpush1.bf16.msra.mxu0 %v2552_v55  ;;  %1939 = vmatpush1.bf16.msra.mxu1 %v2609_v15 }
 0x23b   :  { %1909 = vmatprep.subr.bf16.mxu0 %v2561_v58  ;;  %1941 = vmatprep.subr.bf16.mxu1 %v2615_v18 }
 0x23e   :  { %1911 = vmatpush1.bf16.msra.mxu0 %v2594_v7  ;;  %1943 = vmatpush1.bf16.msra.mxu1 %v2642_v31 }
 0x23f   :  { %1913 = vmatprep.subr.bf16.mxu0 %v2597_v10  ;;  %1945 = vmatprep.subr.bf16.mxu1 %v2645_v32 }
 0x242   :  { %1915 = vmatpush1.bf16.msra.mxu0 %v2630_v24  ;;  %1947 = vmatpush1.bf16.msra.mxu1 %v2664_v40 }
 0x243   :  { %1917 = vmatprep.subr.bf16.mxu0 %v2633_v27  ;;  %1949 = vmatprep.subr.bf16.mxu1 %v2667_v41 }
 0x246   :  { %1919 = vmatpush1.bf16.msra.mxu0 %v2660_v39  ;;  %1951 = vmatpush1.bf16.msra.mxu1 %v2677_v47 }
 0x247   :  { %1953 = vmatprep.subr.bf16.mxu0 %v2402_v4  ;;  %1985 = vmatprep.subr.bf16.mxu1 %v2454_v22 }
 0x2fc   :  { %v509_v49 = vpop.f32.mrb[4].mxu0  ;;  %v580_v50 = vpop.f32.mrb[4].mxu1 }
 0x2fd   :  { %v585_v51 = vadd.f32 %v1601_v35, %v509_v49  ;;  %v511_v53 = vpop.f32.mrb[5].mxu0  ;;  %v582_v54 = vpop.f32.mrb[5].mxu1  ;;  %v587_v2 = vadd.f32 %v1603_v63, %v580_v50  ;;  %v1609_v35 = vld [vmem:[%s3101_s0 + $0x68] sm:$0xff] }
 0x2fe   :  { %v586_v56 = vadd.f32 %v1602_v44, %v511_v53  ;;  %v588_v61 = vadd.f32 %v1604_v60, %v582_v54 }
 0x2ff   :  { %v1605_v57 = vmul.f32 -1.442695, %v585_v51 }
 0x300   :  { %v1606_v59 = vmul.f32 -1.442695, %v586_v56  ;;  %v1607_v1 = vmul.f32 -1.442695, %v588_v61  ;;  %v1610_v61 = vld [vmem:[%s3101_s0 + $0x70] sm:$0xff] }
 0x301   :  { %2267 = vpow2.f32 %v1605_v57 }
 0x302   :  { %2269 = vpow2.f32 %v1606_v59  ;;  %v1611_v59 = vld [vmem:[%s3101_s0 + $0x78] sm:$0xff] }
 0x303   :  { %2271 = vpow2.f32 %v1607_v1 }
 0x304   :  { %2273 = vtanh.f32 %v587_v2 }
 0x30b   :  { %v2268_v5 = vpop.eup %2267 }
 0x30c   :  { %v2270_v6 = vpop.eup %2269  ;;  %v592_v11 = vadd.f32 1.0, %v2268_v5 }
 0x30d   :  { %v598_v12 = vadd.f32 1.0, %v2270_v6  ;;  %v2272_v13 = vpop.eup %2271 }
 0x30e   :  { %2275 = vrcp.f32 %v592_v11  ;;  %v2274_v16 = vpop.eup %2273  ;;  %v605_v23 = vadd.f32 1.0, %v2272_v13 }
 0x30f   :  { %2277 = vrcp.f32 %v598_v12 }
 0x310   :  { %2279 = vrcp.f32 %v605_v23 }
 0x318   :  { %v2276_v19 = vpop.eup %2275 }
 0x319   :  { %v2278_v20 = vpop.eup %2277  ;;  %v609_v21 = vmul.f32 %v2276_v19, %v2274_v16 }
 0x31a   :  { %v608_v28 = vmul.f32 %v2278_v20, %v2781_v34  ;;  %v2280_v36 = vpop.eup %2279  ;;  %v1608_v34 = vld [vmem:[%s3101_s0 + $0x60] sm:$0xff] }
 0x31c   :  { %v2831_v29 = vadd.f32 %v609_v21, %v608_v28 }
 0x31e   :  { %2281 = vtanh.f32 %v2831_v29 }
 0x328   :  { %v2282_v38 = vpop.eup %2281 }
 0x329   :  { %v612_v43 = vmul.f32 %v2282_v38, %v2280_v36 }
 0x32b   :  { %683 = vmatmul.mubr.f32.vlgmr.msra.gmra.mrb[6].mxu0 %v612_v43  ;;  %754 = vmatmul.mubr.f32.vlgmr.msra.gmra.mrb[6].mxu1 %v612_v43 }
 0x32c   :  { %1955 = vmatpush1.bf16.msra.mxu0 %v2413_v8  ;;  %1987 = vmatpush1.bf16.msra.mxu1 %v2462_v25 }
 0x32d   :  { %1957 = vmatprep.subr.bf16.mxu0 %v2415_v9  ;;  %1989 = vmatprep.subr.bf16.mxu1 %v2487_v33 }
 0x32e   :  { %857 = vmatprep.mubr.f32.mxu0 %v2363_v3  ;;  %928 = vmatprep.mubr.f32.mxu1 %v2363_v3 }
 0x330   :  { %1959 = vmatpush1.bf16.msra.mxu0 %v2431_v14  ;;  %1991 = vmatpush1.bf16.msra.mxu1 %v2498_v37 }
 0x331   :  { %1961 = vmatprep.subr.bf16.mxu0 %v2440_v17  ;;  %1993 = vmatprep.subr.bf16.mxu1 %v2522_v45 }
 0x334   :  { %1963 = vmatpush1.bf16.msra.mxu0 %v2465_v26  ;;  %1995 = vmatpush1.bf16.msra.mxu1 %v2531_v48 }
 0x335   :  { %1965 = vmatprep.subr.bf16.mxu0 %v2478_v30  ;;  %1997 = vmatprep.subr.bf16.mxu1 %v2543_v52 }
 0x338   :  { %1967 = vmatpush1.bf16.msra.mxu0 %v2514_v42  ;;  %1999 = vmatpush1.bf16.msra.mxu1 %v2573_v62 }
 0x339   :  { %1969 = vmatprep.subr.bf16.mxu0 %v2525_v46  ;;  %2001 = vmatprep.subr.bf16.mxu1 %v2579_v0 }
 0x33c   :  { %1971 = vmatpush1.bf16.msra.mxu0 %v2552_v55  ;;  %2003 = vmatpush1.bf16.msra.mxu1 %v2609_v15 }
 0x33d   :  { %1973 = vmatprep.subr.bf16.mxu0 %v2561_v58  ;;  %2005 = vmatprep.subr.bf16.mxu1 %v2615_v18 }
 0x340   :  { %1975 = vmatpush1.bf16.msra.mxu0 %v2594_v7  ;;  %2007 = vmatpush1.bf16.msra.mxu1 %v2642_v31 }
 0x341   :  { %1977 = vmatprep.subr.bf16.mxu0 %v2597_v10  ;;  %2009 = vmatprep.subr.bf16.mxu1 %v2645_v32 }
 0x344   :  { %1979 = vmatpush1.bf16.msra.mxu0 %v2630_v24  ;;  %2011 = vmatpush1.bf16.msra.mxu1 %v2664_v40 }
 0x345   :  { %1981 = vmatprep.subr.bf16.mxu0 %v2633_v27  ;;  %2013 = vmatprep.subr.bf16.mxu1 %v2667_v41 }
 0x348   :  { %1983 = vmatpush1.bf16.msra.mxu0 %v2660_v39  ;;  %2015 = vmatpush1.bf16.msra.mxu1 %v2677_v47 }
 0x349   :  { %2017 = vmatprep.subr.bf16.mxu0 %v2402_v4  ;;  %2049 = vmatprep.subr.bf16.mxu1 %v2454_v22 }
 0x3fe   :  { %v684_v44 = vpop.f32.mrb[6].mxu0  ;;  %v755_v49 = vpop.f32.mrb[6].mxu1 }
 0x3ff   :  { %v760_v50 = vadd.f32 %v1608_v34, %v684_v44  ;;  %v686_v51 = vpop.f32.mrb[7].mxu0  ;;  %v757_v53 = vpop.f32.mrb[7].mxu1  ;;  %v762_v1 = vadd.f32 %v1610_v61, %v755_v49  ;;  %v1616_v34 = vld [vmem:[%s3101_s0 + $0x88] sm:$0xff] }
 0x400   :  { %v761_v54 = vadd.f32 %v1609_v35, %v686_v51  ;;  %v763_v60 = vadd.f32 %v1611_v59, %v757_v53 }
 0x401   :  { %v1612_v56 = vmul.f32 -1.442695, %v760_v50 }
 0x402   :  { %v1613_v57 = vmul.f32 -1.442695, %v761_v54  ;;  %v1614_v63 = vmul.f32 -1.442695, %v763_v60  ;;  %v1617_v60 = vld [vmem:[%s3101_s0 + $0x90] sm:$0xff] }
 0x403   :  { %2283 = vpow2.f32 %v1612_v56 }
 0x404   :  { %2285 = vpow2.f32 %v1613_v57  ;;  %v1618_v57 = vld [vmem:[%s3101_s0 + $0x98] sm:$0xff] }
 0x405   :  { %2287 = vpow2.f32 %v1614_v63 }
 0x406   :  { %2289 = vtanh.f32 %v762_v1 }
 0x40d   :  { %v2284_v2 = vpop.eup %2283 }
 0x40e   :  { %v2286_v5 = vpop.eup %2285  ;;  %v767_v6 = vadd.f32 1.0, %v2284_v2 }
 0x40f   :  { %v773_v11 = vadd.f32 1.0, %v2286_v5  ;;  %v2288_v12 = vpop.eup %2287 }
 0x410   :  { %2291 = vrcp.f32 %v767_v6  ;;  %v2290_v13 = vpop.eup %2289  ;;  %v780_v21 = vadd.f32 1.0, %v2288_v12 }
 0x411   :  { %2293 = vrcp.f32 %v773_v11 }
 0x412   :  { %2295 = vrcp.f32 %v780_v21 }
 0x41a   :  { %v2292_v16 = vpop.eup %2291 }
 0x41b   :  { %v2294_v19 = vpop.eup %2293  ;;  %v784_v20 = vmul.f32 %v2292_v16, %v2290_v13 }
 0x41c   :  { %v783_v23 = vmul.f32 %v2294_v19, %v2831_v29  ;;  %v2296_v36 = vpop.eup %2295  ;;  %v1615_v29 = vld [vmem:[%s3101_s0 + $0x80] sm:$0xff] }
 0x41e   :  { %v2881_v28 = vadd.f32 %v784_v20, %v783_v23 }
 0x420   :  { %2297 = vtanh.f32 %v2881_v28 }
 0x42a   :  { %v2298_v38 = vpop.eup %2297 }
 0x42b   :  { %v787_v43 = vmul.f32 %v2298_v38, %v2296_v36 }
 0x42d   :  { %858 = vmatmul.mubr.f32.vlgmr.msra.gmra.mrb[8].mxu0 %v787_v43  ;;  %929 = vmatmul.mubr.f32.vlgmr.msra.gmra.mrb[8].mxu1 %v787_v43 }
 0x42e   :  { %2019 = vmatpush1.bf16.msra.mxu0 %v2413_v8  ;;  %2051 = vmatpush1.bf16.msra.mxu1 %v2462_v25 }
 0x42f   :  { %2021 = vmatprep.subr.bf16.mxu0 %v2415_v9  ;;  %2053 = vmatprep.subr.bf16.mxu1 %v2487_v33 }
 0x430   :  { %1032 = vmatprep.mubr.f32.mxu0 %v2363_v3  ;;  %1103 = vmatprep.mubr.f32.mxu1 %v2363_v3 }
 0x432   :  { %2023 = vmatpush1.bf16.msra.mxu0 %v2431_v14  ;;  %2055 = vmatpush1.bf16.msra.mxu1 %v2498_v37 }
 0x433   :  { %2025 = vmatprep.subr.bf16.mxu0 %v2440_v17  ;;  %2057 = vmatprep.subr.bf16.mxu1 %v2522_v45 }
 0x436   :  { %2027 = vmatpush1.bf16.msra.mxu0 %v2465_v26  ;;  %2059 = vmatpush1.bf16.msra.mxu1 %v2531_v48 }
 0x437   :  { %2029 = vmatprep.subr.bf16.mxu0 %v2478_v30  ;;  %2061 = vmatprep.subr.bf16.mxu1 %v2543_v52 }
 0x43a   :  { %2031 = vmatpush1.bf16.msra.mxu0 %v2514_v42  ;;  %2063 = vmatpush1.bf16.msra.mxu1 %v2573_v62 }
 0x43b   :  { %2033 = vmatprep.subr.bf16.mxu0 %v2525_v46  ;;  %2065 = vmatprep.subr.bf16.mxu1 %v2579_v0 }
 0x43e   :  { %2035 = vmatpush1.bf16.msra.mxu0 %v2552_v55  ;;  %2067 = vmatpush1.bf16.msra.mxu1 %v2609_v15 }
 0x43f   :  { %2037 = vmatprep.subr.bf16.mxu0 %v2561_v58  ;;  %2069 = vmatprep.subr.bf16.mxu1 %v2615_v18 }
 0x442   :  { %2039 = vmatpush1.bf16.msra.mxu0 %v2594_v7  ;;  %2071 = vmatpush1.bf16.msra.mxu1 %v2642_v31 }
 0x443   :  { %2041 = vmatprep.subr.bf16.mxu0 %v2597_v10  ;;  %2073 = vmatprep.subr.bf16.mxu1 %v2645_v32 }
 0x446   :  { %2043 = vmatpush1.bf16.msra.mxu0 %v2630_v24  ;;  %2075 = vmatpush1.bf16.msra.mxu1 %v2664_v40 }
 0x447   :  { %2045 = vmatprep.subr.bf16.mxu0 %v2633_v27  ;;  %2077 = vmatprep.subr.bf16.mxu1 %v2667_v41 }
 0x44a   :  { %2047 = vmatpush1.bf16.msra.mxu0 %v2660_v39  ;;  %2079 = vmatpush1.bf16.msra.mxu1 %v2677_v47 }
 0x44b   :  { %2081 = vmatprep.subr.bf16.mxu0 %v2402_v4  ;;  %2113 = vmatprep.subr.bf16.mxu1 %v2454_v22 }
 0x500   :  { %v859_v35 = vpop.f32.mrb[8].mxu0  ;;  %v930_v44 = vpop.f32.mrb[8].mxu1 }
 0x501   :  { %v935_v49 = vadd.f32 %v1615_v29, %v859_v35  ;;  %v861_v50 = vpop.f32.mrb[9].mxu0  ;;  %v932_v51 = vpop.f32.mrb[9].mxu1  ;;  %v937_v63 = vadd.f32 %v1617_v60, %v930_v44  ;;  %v1623_v29 = vld [vmem:[%s3101_s0 + $0xa8] sm:$0xff] }
 0x502   :  { %v936_v53 = vadd.f32 %v1616_v34, %v861_v50  ;;  %v938_v59 = vadd.f32 %v1618_v57, %v932_v51 }
 0x503   :  { %v1619_v54 = vmul.f32 -1.442695, %v935_v49 }
 0x504   :  { %v1620_v56 = vmul.f32 -1.442695, %v936_v53  ;;  %v1621_v61 = vmul.f32 -1.442695, %v938_v59 }
 0x505   :  { %2299 = vpow2.f32 %v1619_v54 }
 0x506   :  { %2301 = vpow2.f32 %v1620_v56  ;;  %v1624_v56 = vld [vmem:[%s3101_s0 + $0xb0] sm:$0xff] }
 0x507   :  { %2303 = vpow2.f32 %v1621_v61 }
 0x508   :  { %2305 = vtanh.f32 %v937_v63 }
 0x50f   :  { %v2300_v1 = vpop.eup %2299 }
 0x510   :  { %v2302_v2 = vpop.eup %2301  ;;  %v942_v5 = vadd.f32 1.0, %v2300_v1 }
 0x511   :  { %v948_v6 = vadd.f32 1.0, %v2302_v2  ;;  %v2304_v11 = vpop.eup %2303 }
 0x512   :  { %2307 = vrcp.f32 %v942_v5  ;;  %v2306_v12 = vpop.eup %2305  ;;  %v955_v20 = vadd.f32 1.0, %v2304_v11 }
 0x513   :  { %2309 = vrcp.f32 %v948_v6 }
 0x514   :  { %2311 = vrcp.f32 %v955_v20 }
 0x51c   :  { %v2308_v13 = vpop.eup %2307 }
 0x51d   :  { %v2310_v16 = vpop.eup %2309  ;;  %v959_v19 = vmul.f32 %v2308_v13, %v2306_v12 }
 0x51e   :  { %v958_v21 = vmul.f32 %v2310_v16, %v2881_v28  ;;  %v2312_v36 = vpop.eup %2311  ;;  %v1622_v28 = vld [vmem:[%s3101_s0 + $0xa0] sm:$0xff] }
 0x520   :  { %v2931_v23 = vadd.f32 %v959_v19, %v958_v21 }
 0x522   :  { %2313 = vtanh.f32 %v2931_v23 }
 0x52c   :  { %v2314_v38 = vpop.eup %2313 }
 0x52d   :  { %v962_v43 = vmul.f32 %v2314_v38, %v2312_v36  ;;  %v1494_v38 = vld [vmem:[%s3102_s2 + $0x8] sm:$0xff] }
 0x52f   :  { %1033 = vmatmul.mubr.f32.vlgmr.msra.gmra.mrb[10].mxu0 %v962_v43  ;;  %1104 = vmatmul.mubr.f32.vlgmr.msra.gmra.mrb[10].mxu1 %v962_v43 }
 0x530   :  { %2083 = vmatpush1.bf16.msra.mxu0 %v2413_v8  ;;  %2115 = vmatpush1.bf16.msra.mxu1 %v2462_v25 }
 0x531   :  { %2085 = vmatprep.subr.bf16.mxu0 %v2415_v9  ;;  %2117 = vmatprep.subr.bf16.mxu1 %v2487_v33 }
 0x532   :  { %1207 = vmatprep.mubr.f32.mxu0 %v2363_v3  ;;  %1278 = vmatprep.mubr.f32.mxu1 %v2363_v3 }
 0x534   :  { %2087 = vmatpush1.bf16.msra.mxu0 %v2431_v14  ;;  %2119 = vmatpush1.bf16.msra.mxu1 %v2498_v37 }
 0x535   :  { %2089 = vmatprep.subr.bf16.mxu0 %v2440_v17  ;;  %2121 = vmatprep.subr.bf16.mxu1 %v2522_v45 }
 0x538   :  { %2091 = vmatpush1.bf16.msra.mxu0 %v2465_v26  ;;  %2123 = vmatpush1.bf16.msra.mxu1 %v2531_v48 }
 0x539   :  { %2093 = vmatprep.subr.bf16.mxu0 %v2478_v30  ;;  %2125 = vmatprep.subr.bf16.mxu1 %v2543_v52 }
 0x53c   :  { %2095 = vmatpush1.bf16.msra.mxu0 %v2514_v42  ;;  %2127 = vmatpush1.bf16.msra.mxu1 %v2573_v62 }
 0x53d   :  { %2097 = vmatprep.subr.bf16.mxu0 %v2525_v46  ;;  %2129 = vmatprep.subr.bf16.mxu1 %v2579_v0 }
 0x540   :  { %2099 = vmatpush1.bf16.msra.mxu0 %v2552_v55  ;;  %2131 = vmatpush1.bf16.msra.mxu1 %v2609_v15 }
 0x541   :  { %2101 = vmatprep.subr.bf16.mxu0 %v2561_v58  ;;  %2133 = vmatprep.subr.bf16.mxu1 %v2615_v18 }
 0x544   :  { %2103 = vmatpush1.bf16.msra.mxu0 %v2594_v7  ;;  %2135 = vmatpush1.bf16.msra.mxu1 %v2642_v31 }
 0x545   :  { %2105 = vmatprep.subr.bf16.mxu0 %v2597_v10  ;;  %2137 = vmatprep.subr.bf16.mxu1 %v2645_v32 }
 0x548   :  { %2107 = vmatpush1.bf16.msra.mxu0 %v2630_v24  ;;  %2139 = vmatpush1.bf16.msra.mxu1 %v2664_v40 }
 0x549   :  { %2109 = vmatprep.subr.bf16.mxu0 %v2633_v27  ;;  %2141 = vmatprep.subr.bf16.mxu1 %v2667_v41 }
 0x54c   :  { %2111 = vmatpush1.bf16.msra.mxu0 %v2660_v39  ;;  %2143 = vmatpush1.bf16.msra.mxu1 %v2677_v47 }
 0x54d   :  { %2145 = vmatprep.subr.bf16.mxu0 %v2402_v4  ;;  %2177 = vmatprep.subr.bf16.mxu1 %v2454_v22  ;;  %v1625_v4 = vld [vmem:[%s3101_s0 + $0xb8] sm:$0xff] }
 0x602   :  { %v1034_v34 = vpop.f32.mrb[10].mxu0  ;;  %v1105_v35 = vpop.f32.mrb[10].mxu1 }
 0x603   :  { %v1110_v44 = vadd.f32 %v1622_v28, %v1034_v34  ;;  %v1036_v49 = vpop.f32.mrb[11].mxu0  ;;  %v1107_v50 = vpop.f32.mrb[11].mxu1  ;;  %v1112_v59 = vadd.f32 %v1624_v56, %v1105_v35  ;;  %v2364_v28 = vmov 0.0|0.0   ;;  %v1496_v34 = vld [vmem:[%s3102_s2 + $0x18] sm:$0xff] }
 0x604   :  { %v1111_v51 = vadd.f32 %v1623_v29, %v1036_v49  ;;  %v1113_v22 = vadd.f32 %v1625_v4, %v1107_v50  ;;  %v1495_v29 = vld [vmem:[%s3102_s2 + $0x10] sm:$0xff]  ;;  %v1498_v49 = vld [vmem:[%s3102_s2 + $0x28] sm:$0xff]  ;;  %v1501_v4 = vld [vmem:[%s3102_s2 + $0x40] sm:$0xff] }
 0x605   :  { %v1626_v53 = vmul.f32 -1.442695, %v1110_v44  ;;  %v2212_v35 = vpack.c.bf16 %v1496_v34, %v1495_v29  ;;  %v1497_v44 = vld [vmem:[%s3102_s2 + $0x20] sm:$0xff] }
 0x606   :  { %v1627_v54 = vmul.f32 -1.442695, %v1111_v51  ;;  %v1628_v57 = vmul.f32 -1.442695, %v1113_v22  ;;  %v2215_v50 = vpack.c.bf16 %v1498_v49, %v1497_v44  ;;  %v1499_v51 = vld [vmem:[%s3102_s2 + $0x30] sm:$0xff]  ;;  %v1502_v22 = vld [vmem:[%s3102_s2 + $0x48] sm:$0xff] }
 0x607   :  { %2315 = vpow2.f32 %v1626_v53  ;;  %v1500_v53 = vld [vmem:[%s3102_s2 + $0x38] sm:$0xff]  ;;  %v2221_v56 = vpack.c.bf16 %v1502_v22, %v1501_v4 }
 0x608   :  { %2317 = vpow2.f32 %v1627_v54  ;;  %v2218_v54 = vpack.c.bf16 %v1500_v53, %v1499_v51 }
 0x609   :  { %2319 = vpow2.f32 %v1628_v57  ;;  %v1503_v57 = vld [vmem:[%s3102_s2 + $0x50] sm:$0xff] }
 0x60a   :  { %2321 = vtanh.f32 %v1112_v59  ;;  %v1504_v59 = vld [vmem:[%s3102_s2 + $0x58] sm:$0xff] }
 0x611   :  { %v2316_v60 = vpop.eup %2315 }
 0x612   :  { %v2318_v61 = vpop.eup %2317  ;;  %v1117_v63 = vadd.f32 1.0, %v2316_v60  ;;  %v1505_v60 = vld [vmem:[%s3102_s2 + $0x60] sm:$0xff] }
 0x613   :  { %v1123_v1 = vadd.f32 1.0, %v2318_v61  ;;  %v2320_v2 = vpop.eup %2319  ;;  %v2224_v61 = vpack.c.bf16 %v1504_v59, %v1503_v57 }
 0x614   :  { %2323 = vrcp.f32 %v1117_v63  ;;  %v2322_v5 = vpop.eup %2321  ;;  %v1130_v13 = vadd.f32 1.0, %v2320_v2  ;;  %v1506_v63 = vld [vmem:[%s3102_s2 + $0x68] sm:$0xff]  ;;  %v1507_v2 = vld [vmem:[%s3102_s2 + $0x70] sm:$0xff] }
 0x615   :  { %2325 = vrcp.f32 %v1123_v1  ;;  %v2227_v1 = vpack.c.bf16 %v1506_v63, %v1505_v60 }
 0x616   :  { %2327 = vrcp.f32 %v1130_v13 }
 0x61e   :  { %v2324_v6 = vpop.eup %2323 }
 0x61f   :  { %v2326_v11 = vpop.eup %2325  ;;  %v1134_v12 = vmul.f32 %v2324_v6, %v2322_v5  ;;  %v1508_v5 = vld [vmem:[%s3102_s2 + $0x78] sm:$0xff] }
 0x620   :  { %v1133_v16 = vmul.f32 %v2326_v11, %v2931_v23  ;;  %v2328_v20 = vpop.eup %2327  ;;  %v1493_v23 = vld [vmem:[%s3102_s2] sm:$0xff]  ;;  %v2230_v6 = vpack.c.bf16 %v1508_v5, %v1507_v2 }
 0x621   :  { %v2209_v43 = vpack.c.bf16 %v1494_v38, %v1493_v23  ;;  %v1636_v11 = vld [vmem:[%s3101_s0 + $0xe0] sm:$0xff] }
 0x622   :  { %v2981_v19 = vadd.f32 %v1134_v12, %v1133_v16 }
 0x624   :  { %2329 = vtanh.f32 %v2981_v19 }
 0x62e   :  { %v2330_v21 = vpop.eup %2329 }
 0x62f   :  { %v1137_v36 = vmul.f32 %v2330_v21, %v2328_v20 }
 0x631   :  { %1208 = vmatmul.mubr.f32.vlgmr.msra.gmra.mrb[12].mxu0 %v1137_v36  ;;  %1279 = vmatmul.mubr.f32.vlgmr.msra.gmra.mrb[12].mxu1 %v1137_v36 }
 0x632   :  { %2147 = vmatpush1.bf16.msra.mxu0 %v2413_v8  ;;  %2179 = vmatpush1.bf16.msra.mxu1 %v2462_v25  ;;  %v1629_v8 = vld [vmem:[%s3101_s0 + $0xc0] sm:$0xff] }
 0x633   :  { %2149 = vmatprep.subr.bf16.mxu0 %v2415_v9  ;;  %2181 = vmatprep.subr.bf16.mxu1 %v2487_v33  ;;  %v1630_v9 = vld [vmem:[%s3101_s0 + $0xc8] sm:$0xff] }
 0x634   :  { %1382 = vmatprep.mubr.f32.mxu0 %v2363_v3  ;;  %1453 = vmatprep.mubr.f32.mxu1 %v2363_v3 }
 0x636   :  { %2151 = vmatpush1.bf16.msra.mxu0 %v2431_v14  ;;  %2183 = vmatpush1.bf16.msra.mxu1 %v2498_v37 }
 0x637   :  { %2153 = vmatprep.subr.bf16.mxu0 %v2440_v17  ;;  %2185 = vmatprep.subr.bf16.mxu1 %v2522_v45  ;;  %v1632_v45 = vld [vmem:[%s3101_s0 + $0xd8] sm:$0xff] }
 0x63a   :  { %2155 = vmatpush1.bf16.msra.mxu0 %v2465_v26  ;;  %2187 = vmatpush1.bf16.msra.mxu1 %v2531_v48  ;;  %v1631_v48 = vld [vmem:[%s3101_s0 + $0xd0] sm:$0xff] }
 0x63b   :  { %2157 = vmatprep.subr.bf16.mxu0 %v2478_v30  ;;  %2189 = vmatprep.subr.bf16.mxu1 %v2543_v52 }
 0x63e   :  { %2159 = vmatpush1.bf16.msra.mxu0 %v2514_v42  ;;  %2191 = vmatpush1.bf16.msra.mxu1 %v2573_v62 }
 0x63f   :  { %2161 = vmatprep.subr.bf16.mxu0 %v2525_v46  ;;  %2193 = vmatprep.subr.bf16.mxu1 %v2579_v0 }
 0x642   :  { %2163 = vmatpush1.bf16.msra.mxu0 %v2552_v55  ;;  %2195 = vmatpush1.bf16.msra.mxu1 %v2609_v15 }
 0x643   :  { %2165 = vmatprep.subr.bf16.mxu0 %v2561_v58  ;;  %2197 = vmatprep.subr.bf16.mxu1 %v2615_v18 }
 0x646   :  { %2167 = vmatpush1.bf16.msra.mxu0 %v2594_v7  ;;  %2199 = vmatpush1.bf16.msra.mxu1 %v2642_v31 }
 0x647   :  { %2169 = vmatprep.subr.bf16.mxu0 %v2597_v10  ;;  %2201 = vmatprep.subr.bf16.mxu1 %v2645_v32 }
 0x64a   :  { %2171 = vmatpush1.bf16.msra.mxu0 %v2630_v24  ;;  %2203 = vmatpush1.bf16.msra.mxu1 %v2664_v40 }
 0x64b   :  { %2173 = vmatprep.subr.bf16.mxu0 %v2633_v27  ;;  %2205 = vmatprep.subr.bf16.mxu1 %v2667_v41 }
 0x64e   :  { %2175 = vmatpush1.bf16.msra.mxu0 %v2660_v39  ;;  %2207 = vmatpush1.bf16.msra.mxu1 %v2677_v47 }
 0x64f   :  { %2208 = vmatprep.subr.bf16.mxu0 %v2364_v28 }
 0x704   :  { %v1209_v14 = vpop.f32.mrb[12].mxu0  ;;  %v1280_v17 = vpop.f32.mrb[12].mxu1 }
 0x705   :  { %v1285_v25 = vadd.f32 %v1629_v8, %v1209_v14  ;;  %v1211_v26 = vpop.f32.mrb[13].mxu0  ;;  %v1282_v30 = vpop.f32.mrb[13].mxu1  ;;  %v1287_v55 = vadd.f32 %v1631_v48, %v1280_v17  ;;  %v1638_v17 = vld [vmem:[%s3101_s0 + $0xf0] sm:$0xff] }
 0x706   :  { %v1286_v33 = vadd.f32 %v1630_v9, %v1211_v26  ;;  %v1288_v46 = vadd.f32 %v1632_v45, %v1282_v30  ;;  %v1639_v9 = vld [vmem:[%s3101_s0 + $0xf8] sm:$0xff] }
 0x707   :  { %v1633_v37 = vmul.f32 -1.442695, %v1285_v25 }
 0x708   :  { %v1634_v42 = vmul.f32 -1.442695, %v1286_v33  ;;  %v1635_v52 = vmul.f32 -1.442695, %v1288_v46 }
 0x709   :  { %2331 = vpow2.f32 %v1633_v37 }
 0x70a   :  { %2333 = vpow2.f32 %v1634_v42 }
 0x70b   :  { %2335 = vpow2.f32 %v1635_v52 }
 0x70c   :  { %2337 = vtanh.f32 %v1287_v55 }
 0x713   :  { %v2332_v58 = vpop.eup %2331 }
 0x714   :  { %v2334_v62 = vpop.eup %2333  ;;  %v1292_v0 = vadd.f32 1.0, %v2332_v58 }
 0x715   :  { %v1298_v7 = vadd.f32 1.0, %v2334_v62  ;;  %v2336_v10 = vpop.eup %2335 }
 0x716   :  { %2339 = vrcp.f32 %v1292_v0  ;;  %v2338_v15 = vpop.eup %2337  ;;  %v1305_v31 = vadd.f32 1.0, %v2336_v10 }
 0x717   :  { %2341 = vrcp.f32 %v1298_v7 }
 0x718   :  { %2343 = vrcp.f32 %v1305_v31 }
 0x720   :  { %v2340_v18 = vpop.eup %2339 }
 0x721   :  { %v2342_v24 = vpop.eup %2341  ;;  %v1309_v27 = vmul.f32 %v2340_v18, %v2338_v15  ;;  %v1643_v18 = vld [vmem:[%s3103_s3] ss:$0 sm:$0xff] }
 0x722   :  { %v1308_v32 = vmul.f32 %v2342_v24, %v2981_v19  ;;  %v2344_v40 = vpop.eup %2343 }
 0x724   :  { %v3029_v39 = vadd.f32 %v1309_v27, %v1308_v32 }
 0x726   :  { %2345 = vtanh.f32 %v3029_v39 }
 0x730   :  { %v2346_v41 = vpop.eup %2345 }
 0x731   :  { %v1312_v47 = vmul.f32 %v2346_v41, %v2344_v40 }
 0x733   :  { %1383 = vmatmul.mubr.f32.vlgmr.msra.gmra.mrb[14].mxu0 %v1312_v47  ;;  %1454 = vmatmul.mubr.f32.vlgmr.msra.gmra.mrb[14].mxu1 %v1312_v47 }
 0x734   :  { %2210 = vmatpush3.bf16.msra.mxu0 %v2209_v43  ;;  %1693 = vmatprep.mubr.msk.f32.mxu0 %vm2365_vm0, %v2363_v3  ;;  %v1637_v3 = vld [vmem:[%s3101_s0 + $0xe8] sm:$0xff] }
 0x735   :  { %2211 = vmatprep.subr.bf16.mxu0 %v2364_v28 }
 0x738   :  { %2213 = vmatpush3.bf16.msra.mxu0 %v2212_v35 }
 0x739   :  { %2214 = vmatprep.subr.bf16.mxu0 %v2364_v28 }
 0x73c   :  { %2216 = vmatpush3.bf16.msra.mxu0 %v2215_v50 }
 0x73d   :  { %2217 = vmatprep.subr.bf16.mxu0 %v2364_v28 }
 0x740   :  { %2219 = vmatpush3.bf16.msra.mxu0 %v2218_v54 }
 0x741   :  { %2220 = vmatprep.subr.bf16.mxu0 %v2364_v28 }
 0x744   :  { %2222 = vmatpush3.bf16.msra.mxu0 %v2221_v56 }
 0x745   :  { %2223 = vmatprep.subr.bf16.mxu0 %v2364_v28 }
 0x748   :  { %2225 = vmatpush3.bf16.msra.mxu0 %v2224_v61 }
 0x749   :  { %2226 = vmatprep.subr.bf16.mxu0 %v2364_v28 }
 0x74c   :  { %2228 = vmatpush3.bf16.msra.mxu0 %v2227_v1 }
 0x74d   :  { %2229 = vmatprep.subr.bf16.mxu0 %v2364_v28 }
 0x750   :  { %2231 = vmatpush3.bf16.msra.mxu0 %v2230_v6 }
 0x806   :  { %v1384_v12 = vpop.f32.mrb[14].mxu0  ;;  %v1455_v13 = vpop.f32.mrb[14].mxu1 }
 0x807   :  { %v1460_v16 = vadd.f32 %v1636_v11, %v1384_v12  ;;  %v1386_v19 = vpop.f32.mrb[15].mxu0  ;;  %v1457_v20 = vpop.f32.mrb[15].mxu1  ;;  %v1462_v26 = vadd.f32 %v1638_v17, %v1455_v13 }
 0x808   :  { %v1461_v21 = vadd.f32 %v1637_v3, %v1386_v19  ;;  %v1463_v14 = vadd.f32 %v1639_v9, %v1457_v20 }
 0x809   :  { %v1640_v36 = vmul.f32 -1.442695, %v1460_v16 }
 0x80a   :  { %v1641_v8 = vmul.f32 -1.442695, %v1461_v21  ;;  %v1642_v25 = vmul.f32 -1.442695, %v1463_v14 }
 0x80b   :  { %2347 = vpow2.f32 %v1640_v36 }
 0x80c   :  { %2349 = vpow2.f32 %v1641_v8 }
 0x80d   :  { %2351 = vpow2.f32 %v1642_v25 }
 0x80e   :  { %2353 = vtanh.f32 %v1462_v26 }
 0x815   :  { %v2348_v30 = vpop.eup %2347 }
 0x816   :  { %v2350_v33 = vpop.eup %2349  ;;  %v1467_v37 = vadd.f32 1.0, %v2348_v30 }
 0x817   :  { %v1473_v42 = vadd.f32 1.0, %v2350_v33  ;;  %v2352_v45 = vpop.eup %2351 }
 0x818   :  { %2355 = vrcp.f32 %v1467_v37  ;;  %v2354_v46 = vpop.eup %2353  ;;  %v1480_v58 = vadd.f32 1.0, %v2352_v45 }
 0x819   :  { %2357 = vrcp.f32 %v1473_v42 }
 0x81a   :  { %2359 = vrcp.f32 %v1480_v58 }
 0x822   :  { %v2356_v48 = vpop.eup %2355 }
 0x823   :  { %v2358_v52 = vpop.eup %2357  ;;  %v1484_v55 = vmul.f32 %v2356_v48, %v2354_v46 }
 0x824   :  { %v1483_v62 = vmul.f32 %v2358_v52, %v3029_v39  ;;  %v2360_v7 = vpop.eup %2359 }
 0x826   :  { %v1485_v0 = vadd.f32 %v1484_v55, %v1483_v62 }
 0x828   :  { %2361 = vtanh.f32 %v1485_v0 }
 0x832   :  { %v2362_v10 = vpop.eup %2361 }
 0x833   :  { %v1487_v15 = vmul.f32 %v2362_v10, %v2360_v7 }
 0x835   :  { %1694 = vmatmul.mubr.f32.vlgmr.msra.gmra.mrb[16].mxu0 %v1487_v15 }
 0x908   :  { %v1582_v24 = vpop.f32.mrb[16].mxu0 }
 0x909   :  { %v1583_v27 = vadd.f32 %v1643_v18, %v1582_v24  ;;  %v1695_v31 = vpop.f32.mrb[17].mxu0 }
 0x90b   :  { %1586 = vst [vmem:[%s3104_s4] sm:$0xff] %v1583_v27 }

</bundles_post_ra>
